<compile_context>
chip_gen: v5e
topology: v5e:2x2
jax: 0.10.0
libtpu: 0.0.40
codegen_flags: <defaults>
</compile_context>

<pallas_src>
import functools

import jax
import jax.numpy as jnp
import numpy as np
from jax import lax
from jax.experimental import pallas as pl
from jax.experimental.pallas import tpu as pltpu


def cbam_kernel(w1t_ref, b1_ref, w2t_ref, b2_ref, a_avg_ref, a_max_ref, bsp_ref,
                x_ref, o_ref, *, elem_dtype):
    # x block: (Bt, C, HW), lane-dense last axis.
    x = x_ref[...].astype(elem_dtype)

    # ---------------- channel attention (batched over the block) ----------------
    # AdaptiveAvgPool2d(1): lane-axis reduction, accumulated in f32.
    pooled = jnp.mean(x.astype(jnp.float32), axis=2)               # (Bt, C)
    h = jnp.dot(pooled, w1t_ref[...],
                preferred_element_type=jnp.float32) + b1_ref[...]
    h = jnp.maximum(h, 0.0)                                        # (Bt, hidden)
    ca = jnp.dot(h, w2t_ref[...],
                 preferred_element_type=jnp.float32) + b2_ref[...]
    ca = jax.nn.sigmoid(ca)                                        # (Bt, C)
    x_ca = x * ca.astype(elem_dtype)[:, :, None]                   # (Bt, C, HW)

    # ---------------- spatial attention: conv7x7 as MXU matmuls ----------------
    avg_map = jnp.mean(x_ca.astype(jnp.float32), axis=1)           # (Bt, HW)
    max_map = jnp.max(x_ca, axis=1).astype(jnp.float32)            # (Bt, HW)
    mm_dtype = a_avg_ref.dtype            # bf16: native MXU rate, f32 accumulation
    logits = (jnp.dot(avg_map.astype(mm_dtype), a_avg_ref[...],
                      preferred_element_type=jnp.float32)
              + jnp.dot(max_map.astype(mm_dtype), a_max_ref[...],
                        preferred_element_type=jnp.float32)
              + bsp_ref[0])
    sa = jax.nn.sigmoid(logits)                                    # (Bt, HW), f32

    o_ref[...] = (x_ca * sa.astype(elem_dtype)[:, None, :]).astype(o_ref.dtype)


def _conv7x7_as_matrix(wsp, H, W):
    """Dense matrix A (2*H*W, H*W) with conv2d(maps, wsp, pad=3) == maps_flat @ A.

    A[c*HW + iy*W + ix, oy*W + ox] = wsp[c, iy-oy+3, ix-ox+3] when the kernel
    offset is in [0, 6] on both axes, else 0 (zero padding).  Suitable for small
    H*W (here 256).
    """
    ky = jnp.arange(H)[:, None] - jnp.arange(H)[None, :] + 3      # (H_in, H_out)
    kx = jnp.arange(W)[:, None] - jnp.arange(W)[None, :] + 3      # (W_in, W_out)
    valid = ((ky >= 0) & (ky <= 6))[:, None, :, None] & \
            ((kx >= 0) & (kx <= 6))[None, :, None, :]             # (H,W,H,W)
    ky_c = jnp.clip(ky, 0, 6)
    kx_c = jnp.clip(kx, 0, 6)
    taps = wsp[:, ky_c[:, None, :, None], kx_c[None, :, None, :]]  # (2,H,W,H,W)
    A = jnp.where(valid[None], taps, 0.0)
    return A.reshape(2 * H * W, H * W).astype(jnp.float32)


def _tpu_config():
    """Generation-aware tiling / VMEM budget."""
    kind = ""
    try:
        kind = (getattr(jax.devices()[0], "device_kind", "") or "").lower()
    except Exception:
        pass
    if "v7" in kind:
        # 2 TensorCores, 64 MiB physical VMEM: keep >=2 grid steps, smaller blocks.
        return {"two_tc": True, "is_v5": False,
                "target_bytes": 2 << 20, "vmem_limit": 48 << 20}
    # v5e / v6e: single TensorCore, 128 MiB VMEM -> fewer, larger grid steps.
    return {"two_tc": False, "is_v5": "v5" in kind,
            "target_bytes": 6 << 20, "vmem_limit": 64 << 20}


def _choose_batch_tile(N, C, HW, itemsize, *, target_bytes, keep_two_steps):
    cap = max(1, target_bytes // max(1, C * HW * itemsize))
    if keep_two_steps and N >= 2:
        cap = min(cap, N // 2)        # >= 2 grid steps so both v7x TCs get work
    cap = max(1, min(cap, N))
    divisors = [d for d in range(1, cap + 1) if N % d == 0]
    mult8 = [d for d in divisors if d % 8 == 0]   # unpadded sublane dim if possible
    return mult8[-1] if mult8 else divisors[-1]


def cbam_pallas(x, w1, b1, w2, b2, wsp, bsp, *, spatial_matmul_dtype=jnp.bfloat16):
    N, C, H, W = x.shape
    hidden = w1.shape[0]
    HW = H * W

    cfg = _tpu_config()

    # TODO(synk): for HW >~ 1024, replace the dense (2*HW, HW) Toeplitz matrix with a
    # K-tiled accumulation or a 7-row banded pltpu.roll shift scheme -- dense A is
    # quadratic in HW and would exhaust v7x's 64 MiB VMEM long before v5e/v6e care.
    a_bytes = 2 * HW * HW * np.dtype(spatial_matmul_dtype).itemsize
    assert a_bytes <= (16 << 20), (
        f"dense conv-as-matrix is {a_bytes / 2**20:.1f} MiB; tile it for this image size")

    x_flat = x.reshape(N, C, HW)                              # lane-dense layout
    w1t = jnp.transpose(w1).astype(jnp.float32)               # (C, hidden)
    b1r = b1.reshape(1, hidden).astype(jnp.float32)
    w2t = jnp.transpose(w2).astype(jnp.float32)               # (hidden, C)
    b2r = b2.reshape(1, C).astype(jnp.float32)
    A = _conv7x7_as_matrix(wsp.astype(jnp.float32), H, W)     # (2*HW, HW)
    a_avg = A[:HW].astype(spatial_matmul_dtype)               # (HW, HW)
    a_max = A[HW:].astype(spatial_matmul_dtype)               # (HW, HW)
    bsp_s = bsp.reshape(1).astype(jnp.float32)

    # bf16 elementwise only where the VPU has bf16 (v6e/v7x) and the input is bf16.
    if x.dtype == jnp.bfloat16 and not cfg["is_v5"]:
        elem_dtype = jnp.bfloat16
    else:
        elem_dtype = jnp.float32

    Bt = _choose_batch_tile(N, C, HW, x.dtype.itemsize,
                            target_bytes=cfg["target_bytes"],
                            keep_two_steps=cfg["two_tc"])
    grid = (N // Bt,)

    kernel = functools.partial(cbam_kernel, elem_dtype=elem_dtype)

    def build(single_buffer):
        if single_buffer:
            def inv_spec(shape):
                # Grid-invariant operand: single buffer (constant index_map means
                # double-buffering only doubles VMEM, no pipelining benefit).
                return pl.BlockSpec(shape, lambda b: (0,) * len(shape),
                                    pipeline_mode=pl.Buffered(1))
        else:
            def inv_spec(shape):
                return pl.BlockSpec(shape, lambda b: (0,) * len(shape))

        return pl.pallas_call(
            kernel,
            out_shape=jax.ShapeDtypeStruct((N, C, HW), x.dtype),
            grid_spec=pltpu.PrefetchScalarGridSpec(
                num_scalar_prefetch=0,
                grid=grid,
                in_specs=[
                    inv_spec((C, hidden)),                              # w1.T
                    inv_spec((1, hidden)),                              # b1
                    inv_spec((hidden, C)),                              # w2.T
                    inv_spec((1, C)),                                   # b2
                    inv_spec((HW, HW)),                                 # A (avg half)
                    inv_spec((HW, HW)),                                 # A (max half)
                    pl.BlockSpec(memory_space=pltpu.MemorySpace.SMEM),  # conv bias
                    pl.BlockSpec((Bt, C, HW), lambda b: (b, 0, 0)),     # x block
                ],
                out_specs=pl.BlockSpec((Bt, C, HW), lambda b: (b, 0, 0)),
            ),
            compiler_params=pltpu.CompilerParams(
                dimension_semantics=("parallel",),
                vmem_limit_bytes=cfg["vmem_limit"]),
        )

    args = (w1t, b1r, w2t, b2r, a_avg, a_max, bsp_s, x_flat)
    try:
        out_flat = build(single_buffer=True)(*args)
    except Exception:
        # Installed jax may not support pipeline_mode=pl.Buffered(1) on BlockSpec;
        # fall back to the default double-buffered specs (costs ~|A| extra VMEM).
        out_flat = build(single_buffer=False)(*args)

    return out_flat.reshape(N, C, H, W)


def cbam_ref(x, w1, b1, w2, b2, wsp, bsp):
    # Pure-JAX reference mirroring the PyTorch forward.
    pooled = x.mean(axis=(2, 3))                               # (N, C)
    h = jax.nn.relu(pooled @ w1.T + b1)                        # (N, C//r)
    ca = jax.nn.sigmoid(h @ w2.T + b2)                         # (N, C)
    x1 = x * ca[:, :, None, None]
    avg = x1.mean(axis=1, keepdims=True)
    mx = x1.max(axis=1, keepdims=True)
    inp = jnp.concatenate([avg, mx], axis=1)                   # (N, 2, H, W)
    conv = lax.conv_general_dilated(inp, wsp[None], (1, 1), ((3, 3), (3, 3)),
                                    dimension_numbers=("NCHW", "OIHW", "NCHW"))
    sa = jax.nn.sigmoid(conv + bsp)
    return x1 * sa


if __name__ == "__main__":
    N, C, H, W = 2, 32, 16, 16
    reduction = 16
    hidden = C // reduction

    key = jax.random.PRNGKey(0)
    ks = jax.random.split(key, 7)
    x = jax.random.normal(ks[0], (N, C, H, W), jnp.float32)
    # Deterministic synthetic parameters (same shapes as the nn.Module's layers).
    w1 = jax.random.normal(ks[1], (hidden, C), jnp.float32) * 0.1   # Conv2d(C, C//r, 1)
    b1 = jax.random.normal(ks[2], (hidden,), jnp.float32) * 0.1
    w2 = jax.random.normal(ks[3], (C, hidden), jnp.float32) * 0.1   # Conv2d(C//r, C, 1)
    b2 = jax.random.normal(ks[4], (C,), jnp.float32) * 0.1
    wsp = jax.random.normal(ks[5], (2, 7, 7), jnp.float32) * 0.1    # Conv2d(2, 1, 7, padding=3)
    bsp = jax.random.normal(ks[6], (1,), jnp.float32) * 0.1

    out = cbam_pallas(x, w1, b1, w2, b2, wsp, bsp)
    out = jax.block_until_ready(out)

    ref = cbam_ref(x, w1, b1, w2, b2, wsp, bsp)
    # 5e-3 tolerance covers the bf16 spatial-attention matmul (f32 accumulation);
    # all other arithmetic stays in f32 for f32 inputs.
    np.testing.assert_allclose(np.asarray(out), np.asarray(ref), rtol=5e-3, atol=5e-3)
    print("KERNEL_OK")
</pallas_src>

<mosaic_0001>
module attributes {stable_mosaic.version = 11 : i64} {
  func.func @cbam_kernel(%arg0: i32, %arg1: memref<32x2xf32, #tpu.memory_space<vmem>>, %arg2: memref<1x2xf32, #tpu.memory_space<vmem>>, %arg3: memref<2x32xf32, #tpu.memory_space<vmem>>, %arg4: memref<1x32xf32, #tpu.memory_space<vmem>>, %arg5: memref<256x256xbf16, #tpu.memory_space<vmem>>, %arg6: memref<256x256xbf16, #tpu.memory_space<vmem>>, %arg7: memref<1xf32, #tpu.memory_space<smem>>, %arg8: memref<2x32x256xf32, #tpu.memory_space<vmem>>, %arg9: memref<2x32x256xf32, #tpu.memory_space<vmem>>) attributes {dimension_semantics = [#tpu.dimension_semantics<parallel>], iteration_bounds = array<i64: 1>, scalar_prefetch = 0 : i64, scratch_operands = 0 : i64, tpu.core_type = #tpu.core_type<tc>, window_params = [{pipeline_mode = #tpu.pipeline_mode<synchronous>, transform_indices = @transform_0, window_bounds = array<i64: 32, 2>}, {pipeline_mode = #tpu.pipeline_mode<synchronous>, transform_indices = @transform_1, window_bounds = array<i64: 1, 2>}, {pipeline_mode = #tpu.pipeline_mode<synchronous>, transform_indices = @transform_2, window_bounds = array<i64: 2, 32>}, {pipeline_mode = #tpu.pipeline_mode<synchronous>, transform_indices = @transform_3, window_bounds = array<i64: 1, 32>}, {pipeline_mode = #tpu.pipeline_mode<synchronous>, transform_indices = @transform_4, window_bounds = array<i64: 256, 256>}, {pipeline_mode = #tpu.pipeline_mode<synchronous>, transform_indices = @transform_5, window_bounds = array<i64: 256, 256>}, {transform_indices = @transform_6, window_bounds = array<i64: 1>}, {transform_indices = @transform_7, window_bounds = array<i64: 2, 32, 256>}, {transform_indices = @transform_8, window_bounds = array<i64: 2, 32, 256>}]} {
    %c0 = arith.constant 0 : index
    %c0_0 = arith.constant 0 : index
    %c0_1 = arith.constant 0 : index
    %0 = vector.load %arg8[%c0, %c0_0, %c0_1] : memref<2x32x256xf32, #tpu.memory_space<vmem>>, vector<2x32x256xf32>
    %cst = arith.constant dense<0.000000e+00> : vector<2x32xf32>
    %1 = vector.multi_reduction <add>, %0, %cst [2] : vector<2x32x256xf32> to vector<2x32xf32>
    %cst_2 = arith.constant 2.560000e+02 : f32
    %2 = vector.broadcast %cst_2 : f32 to vector<2x32xf32>
    %3 = arith.divf %1, %2 : vector<2x32xf32>
    %c0_3 = arith.constant 0 : index
    %c0_4 = arith.constant 0 : index
    %4 = vector.load %arg1[%c0_3, %c0_4] : memref<32x2xf32, #tpu.memory_space<vmem>>, vector<32x2xf32>
    %cst_5 = arith.constant dense<0.000000e+00> : vector<2x2xf32>
    %5 = tpu.matmul %3, %4, %cst_5 {dimension_numbers = #tpu.dot_dimension_numbers<[1], [0], [0], [1], [0, 0, 1, 1], [], []>} : vector<2x32xf32>, vector<32x2xf32>, vector<2x2xf32> -> vector<2x2xf32>
    %c0_6 = arith.constant 0 : index
    %c0_7 = arith.constant 0 : index
    %6 = vector.load %arg2[%c0_6, %c0_7] : memref<1x2xf32, #tpu.memory_space<vmem>>, vector<1x2xf32>
    %7 = vector.broadcast %6 : vector<1x2xf32> to vector<2x2xf32>
    %8 = arith.addf %5, %7 : vector<2x2xf32>
    %cst_8 = arith.constant 0.000000e+00 : f32
    %9 = vector.broadcast %cst_8 : f32 to vector<2x2xf32>
    %10 = arith.maximumf %8, %9 : vector<2x2xf32>
    %c0_9 = arith.constant 0 : index
    %c0_10 = arith.constant 0 : index
    %11 = vector.load %arg3[%c0_9, %c0_10] : memref<2x32xf32, #tpu.memory_space<vmem>>, vector<2x32xf32>
    %cst_11 = arith.constant dense<0.000000e+00> : vector<2x32xf32>
    %12 = tpu.matmul %10, %11, %cst_11 {dimension_numbers = #tpu.dot_dimension_numbers<[1], [0], [0], [1], [0, 0, 1, 1], [], []>} : vector<2x2xf32>, vector<2x32xf32>, vector<2x32xf32> -> vector<2x32xf32>
    %c0_12 = arith.constant 0 : index
    %c0_13 = arith.constant 0 : index
    %13 = vector.load %arg4[%c0_12, %c0_13] : memref<1x32xf32, #tpu.memory_space<vmem>>, vector<1x32xf32>
    %14 = vector.broadcast %13 : vector<1x32xf32> to vector<2x32xf32>
    %15 = arith.addf %12, %14 : vector<2x32xf32>
    %16 = arith.negf %15 : vector<2x32xf32>
    %17 = math.exp %16 : vector<2x32xf32>
    %cst_14 = arith.constant 1.000000e+00 : f32
    %18 = vector.broadcast %cst_14 : f32 to vector<2x32xf32>
    %19 = arith.addf %18, %17 : vector<2x32xf32>
    %20 = arith.divf %18, %19 : vector<2x32xf32>
    %21 = vector.shape_cast %20 : vector<2x32xf32> to vector<2x32x1xf32>
    %22 = vector.broadcast %21 : vector<2x32x1xf32> to vector<2x32x256xf32>
    %23 = arith.mulf %0, %22 : vector<2x32x256xf32>
    %cst_15 = arith.constant dense<0.000000e+00> : vector<2x256xf32>
    %24 = vector.multi_reduction <add>, %23, %cst_15 [1] : vector<2x32x256xf32> to vector<2x256xf32>
    %cst_16 = arith.constant 3.200000e+01 : f32
    %25 = vector.broadcast %cst_16 : f32 to vector<2x256xf32>
    %26 = arith.divf %24, %25 : vector<2x256xf32>
    %cst_17 = arith.constant dense<0xFF800000> : vector<2x256xf32>
    %27 = vector.multi_reduction <maximumf>, %23, %cst_17 [1] : vector<2x32x256xf32> to vector<2x256xf32>
    %28 = arith.truncf %26 : vector<2x256xf32> to vector<2x256xbf16>
    %c0_18 = arith.constant 0 : index
    %c0_19 = arith.constant 0 : index
    %29 = vector.load %arg5[%c0_18, %c0_19] : memref<256x256xbf16, #tpu.memory_space<vmem>>, vector<256x256xbf16>
    %cst_20 = arith.constant dense<0.000000e+00> : vector<2x256xf32>
    %30 = tpu.matmul %28, %29, %cst_20 {dimension_numbers = #tpu.dot_dimension_numbers<[1], [0], [0], [1], [0, 0, 1, 1], [], []>} : vector<2x256xbf16>, vector<256x256xbf16>, vector<2x256xf32> -> vector<2x256xf32>
    %31 = arith.truncf %27 : vector<2x256xf32> to vector<2x256xbf16>
    %c0_21 = arith.constant 0 : index
    %c0_22 = arith.constant 0 : index
    %32 = vector.load %arg6[%c0_21, %c0_22] : memref<256x256xbf16, #tpu.memory_space<vmem>>, vector<256x256xbf16>
    %cst_23 = arith.constant dense<0.000000e+00> : vector<2x256xf32>
    %33 = tpu.matmul %31, %32, %cst_23 {dimension_numbers = #tpu.dot_dimension_numbers<[1], [0], [0], [1], [0, 0, 1, 1], [], []>} : vector<2x256xbf16>, vector<256x256xbf16>, vector<2x256xf32> -> vector<2x256xf32>
    %34 = arith.addf %30, %33 : vector<2x256xf32>
    %c0_24 = arith.constant 0 : index
    %35 = memref.load %arg7[%c0_24] : memref<1xf32, #tpu.memory_space<smem>>
    %36 = vector.broadcast %35 : f32 to vector<2x256xf32>
    %37 = arith.addf %34, %36 : vector<2x256xf32>
    %38 = arith.negf %37 : vector<2x256xf32>
    %39 = math.exp %38 : vector<2x256xf32>
    %cst_25 = arith.constant 1.000000e+00 : f32
    %40 = vector.broadcast %cst_25 : f32 to vector<2x256xf32>
    %41 = arith.addf %40, %39 : vector<2x256xf32>
    %42 = arith.divf %40, %41 : vector<2x256xf32>
    %43 = vector.shape_cast %42 : vector<2x256xf32> to vector<2x1x256xf32>
    %44 = vector.broadcast %43 : vector<2x1x256xf32> to vector<2x32x256xf32>
    %45 = arith.mulf %23, %44 : vector<2x32x256xf32>
    %c0_26 = arith.constant 0 : index
    %c0_27 = arith.constant 0 : index
    %c0_28 = arith.constant 0 : index
    %46 = vector.load %arg9[%c0_26, %c0_27, %c0_28] : memref<2x32x256xf32, #tpu.memory_space<vmem>>, vector<2x32x256xf32>
    tpu.vector_store %arg9[%c0_26, %c0_27, %c0_28], %45 {strides = array<i32>} : memref<2x32x256xf32, #tpu.memory_space<vmem>>, vector<2x32x256xf32>,
    return
  }
  func.func @transform_0(%arg0: i32) -> (i32, i32) {
    %c0_i32 = arith.constant 0 : i32
    %c0_i32_0 = arith.constant 0 : i32
    %c0_i32_1 = arith.constant 0 : i32
    return %c0_i32, %c0_i32_0 : i32, i32
  }
  func.func @transform_1(%arg0: i32) -> (i32, i32) {
    %c0_i32 = arith.constant 0 : i32
    %c0_i32_0 = arith.constant 0 : i32
    %c0_i32_1 = arith.constant 0 : i32
    return %c0_i32, %c0_i32_0 : i32, i32
  }
  func.func @transform_2(%arg0: i32) -> (i32, i32) {
    %c0_i32 = arith.constant 0 : i32
    %c0_i32_0 = arith.constant 0 : i32
    %c0_i32_1 = arith.constant 0 : i32
    return %c0_i32, %c0_i32_0 : i32, i32
  }
  func.func @transform_3(%arg0: i32) -> (i32, i32) {
    %c0_i32 = arith.constant 0 : i32
    %c0_i32_0 = arith.constant 0 : i32
    %c0_i32_1 = arith.constant 0 : i32
    return %c0_i32, %c0_i32_0 : i32, i32
  }
  func.func @transform_4(%arg0: i32) -> (i32, i32) {
    %c0_i32 = arith.constant 0 : i32
    %c0_i32_0 = arith.constant 0 : i32
    %c0_i32_1 = arith.constant 0 : i32
    return %c0_i32, %c0_i32_0 : i32, i32
  }
  func.func @transform_5(%arg0: i32) -> (i32, i32) {
    %c0_i32 = arith.constant 0 : i32
    %c0_i32_0 = arith.constant 0 : i32
    %c0_i32_1 = arith.constant 0 : i32
    return %c0_i32, %c0_i32_0 : i32, i32
  }
  func.func @transform_6(%arg0: i32) -> i32 {
    %c0_i32 = arith.constant 0 : i32
    %c0_i32_0 = arith.constant 0 : i32
    return %c0_i32 : i32
  }
  func.func @transform_7(%arg0: i32) -> (i32, i32, i32) {
    %c0_i32 = arith.constant 0 : i32
    %c0_i32_0 = arith.constant 0 : i32
    %c0_i32_1 = arith.constant 0 : i32
    return %arg0, %c0_i32, %c0_i32_0 : i32, i32, i32
  }
  func.func @transform_8(%arg0: i32) -> (i32, i32, i32) {
    %c0_i32 = arith.constant 0 : i32
    %c0_i32_0 = arith.constant 0 : i32
    %c0_i32_1 = arith.constant 0 : i32
    return %arg0, %c0_i32, %c0_i32_0 : i32, i32, i32
  }
}

module attributes {stable_mosaic.version = 11 : i64} {
  func.func @cbam_kernel(%arg0: i32, %arg1: memref<32x2xf32, #tpu.memory_space<vmem>>, %arg2: memref<1x2xf32, #tpu.memory_space<vmem>>, %arg3: memref<2x32xf32, #tpu.memory_space<vmem>>, %arg4: memref<1x32xf32, #tpu.memory_space<vmem>>, %arg5: memref<256x256xbf16, #tpu.memory_space<vmem>>, %arg6: memref<256x256xbf16, #tpu.memory_space<vmem>>, %arg7: memref<1xf32, #tpu.memory_space<smem>>, %arg8: memref<2x32x256xf32, #tpu.memory_space<vmem>>, %arg9: memref<2x32x256xf32, #tpu.memory_space<vmem>>) attributes {dimension_semantics = [#tpu.dimension_semantics<parallel>], iteration_bounds = array<i64: 1>, scalar_prefetch = 0 : i64, scratch_operands = 0 : i64, tpu.core_type = #tpu.core_type<tc>, window_params = [{pipeline_mode = #tpu.pipeline_mode<synchronous>, transform_indices = @transform_0, window_bounds = array<i64: 32, 2>}, {pipeline_mode = #tpu.pipeline_mode<synchronous>, transform_indices = @transform_1, window_bounds = array<i64: 1, 2>}, {pipeline_mode = #tpu.pipeline_mode<synchronous>, transform_indices = @transform_2, window_bounds = array<i64: 2, 32>}, {pipeline_mode = #tpu.pipeline_mode<synchronous>, transform_indices = @transform_3, window_bounds = array<i64: 1, 32>}, {pipeline_mode = #tpu.pipeline_mode<synchronous>, transform_indices = @transform_4, window_bounds = array<i64: 256, 256>}, {pipeline_mode = #tpu.pipeline_mode<synchronous>, transform_indices = @transform_5, window_bounds = array<i64: 256, 256>}, {transform_indices = @transform_6, window_bounds = array<i64: 1>}, {transform_indices = @transform_7, window_bounds = array<i64: 2, 32, 256>}, {transform_indices = @transform_8, window_bounds = array<i64: 2, 32, 256>}]} {
    %c0 = arith.constant 0 : index
    %c0_0 = arith.constant 0 : index
    %c0_1 = arith.constant 0 : index
    %0 = vector.load %arg8[%c0, %c0_0, %c0_1] : memref<2x32x256xf32, #tpu.memory_space<vmem>>, vector<2x32x256xf32>
    %cst = arith.constant dense<0.000000e+00> : vector<2x32xf32>
    %1 = vector.multi_reduction <add>, %0, %cst [2] : vector<2x32x256xf32> to vector<2x32xf32>
    %cst_2 = arith.constant 2.560000e+02 : f32
    %2 = vector.broadcast %cst_2 : f32 to vector<2x32xf32>
    %3 = arith.divf %1, %2 : vector<2x32xf32>
    %c0_3 = arith.constant 0 : index
    %c0_4 = arith.constant 0 : index
    %4 = vector.load %arg1[%c0_3, %c0_4] : memref<32x2xf32, #tpu.memory_space<vmem>>, vector<32x2xf32>
    %cst_5 = arith.constant dense<0.000000e+00> : vector<2x2xf32>
    %5 = tpu.matmul %3, %4, %cst_5 {dimension_numbers = #tpu.dot_dimension_numbers<[1], [0], [0], [1], [0, 0, 1, 1], [], []>} : vector<2x32xf32>, vector<32x2xf32>, vector<2x2xf32> -> vector<2x2xf32>
    %c0_6 = arith.constant 0 : index
    %c0_7 = arith.constant 0 : index
    %6 = vector.load %arg2[%c0_6, %c0_7] : memref<1x2xf32, #tpu.memory_space<vmem>>, vector<1x2xf32>
    %7 = vector.broadcast %6 : vector<1x2xf32> to vector<2x2xf32>
    %8 = arith.addf %5, %7 : vector<2x2xf32>
    %cst_8 = arith.constant 0.000000e+00 : f32
    %9 = vector.broadcast %cst_8 : f32 to vector<2x2xf32>
    %10 = arith.maximumf %8, %9 : vector<2x2xf32>
    %c0_9 = arith.constant 0 : index
    %c0_10 = arith.constant 0 : index
    %11 = vector.load %arg3[%c0_9, %c0_10] : memref<2x32xf32, #tpu.memory_space<vmem>>, vector<2x32xf32>
    %cst_11 = arith.constant dense<0.000000e+00> : vector<2x32xf32>
    %12 = tpu.matmul %10, %11, %cst_11 {dimension_numbers = #tpu.dot_dimension_numbers<[1], [0], [0], [1], [0, 0, 1, 1], [], []>} : vector<2x2xf32>, vector<2x32xf32>, vector<2x32xf32> -> vector<2x32xf32>
    %c0_12 = arith.constant 0 : index
    %c0_13 = arith.constant 0 : index
    %13 = vector.load %arg4[%c0_12, %c0_13] : memref<1x32xf32, #tpu.memory_space<vmem>>, vector<1x32xf32>
    %14 = vector.broadcast %13 : vector<1x32xf32> to vector<2x32xf32>
    %15 = arith.addf %12, %14 : vector<2x32xf32>
    %16 = arith.negf %15 : vector<2x32xf32>
    %17 = math.exp %16 : vector<2x32xf32>
    %cst_14 = arith.constant 1.000000e+00 : f32
    %18 = vector.broadcast %cst_14 : f32 to vector<2x32xf32>
    %19 = arith.addf %18, %17 : vector<2x32xf32>
    %20 = arith.divf %18, %19 : vector<2x32xf32>
    %21 = vector.shape_cast %20 : vector<2x32xf32> to vector<2x32x1xf32>
    %22 = vector.broadcast %21 : vector<2x32x1xf32> to vector<2x32x256xf32>
    %23 = arith.mulf %0, %22 : vector<2x32x256xf32>
    %cst_15 = arith.constant dense<0.000000e+00> : vector<2x256xf32>
    %24 = vector.multi_reduction <add>, %23, %cst_15 [1] : vector<2x32x256xf32> to vector<2x256xf32>
    %cst_16 = arith.constant 3.200000e+01 : f32
    %25 = vector.broadcast %cst_16 : f32 to vector<2x256xf32>
    %26 = arith.divf %24, %25 : vector<2x256xf32>
    %cst_17 = arith.constant dense<0xFF800000> : vector<2x256xf32>
    %27 = vector.multi_reduction <maximumf>, %23, %cst_17 [1] : vector<2x32x256xf32> to vector<2x256xf32>
    %28 = arith.truncf %26 : vector<2x256xf32> to vector<2x256xbf16>
    %c0_18 = arith.constant 0 : index
    %c0_19 = arith.constant 0 : index
    %29 = vector.load %arg5[%c0_18, %c0_19] : memref<256x256xbf16, #tpu.memory_space<vmem>>, vector<256x256xbf16>
    %cst_20 = arith.constant dense<0.000000e+00> : vector<2x256xf32>
    %30 = tpu.matmul %28, %29, %cst_20 {dimension_numbers = #tpu.dot_dimension_numbers<[1], [0], [0], [1], [0, 0, 1, 1], [], []>} : vector<2x256xbf16>, vector<256x256xbf16>, vector<2x256xf32> -> vector<2x256xf32>
    %31 = arith.truncf %27 : vector<2x256xf32> to vector<2x256xbf16>
    %c0_21 = arith.constant 0 : index
    %c0_22 = arith.constant 0 : index
    %32 = vector.load %arg6[%c0_21, %c0_22] : memref<256x256xbf16, #tpu.memory_space<vmem>>, vector<256x256xbf16>
    %cst_23 = arith.constant dense<0.000000e+00> : vector<2x256xf32>
    %33 = tpu.matmul %31, %32, %cst_23 {dimension_numbers = #tpu.dot_dimension_numbers<[1], [0], [0], [1], [0, 0, 1, 1], [], []>} : vector<2x256xbf16>, vector<256x256xbf16>, vector<2x256xf32> -> vector<2x256xf32>
    %34 = arith.addf %30, %33 : vector<2x256xf32>
    %c0_24 = arith.constant 0 : index
    %35 = memref.load %arg7[%c0_24] : memref<1xf32, #tpu.memory_space<smem>>
    %36 = vector.broadcast %35 : f32 to vector<2x256xf32>
    %37 = arith.addf %34, %36 : vector<2x256xf32>
    %38 = arith.negf %37 : vector<2x256xf32>
    %39 = math.exp %38 : vector<2x256xf32>
    %cst_25 = arith.constant 1.000000e+00 : f32
    %40 = vector.broadcast %cst_25 : f32 to vector<2x256xf32>
    %41 = arith.addf %40, %39 : vector<2x256xf32>
    %42 = arith.divf %40, %41 : vector<2x256xf32>
    %43 = vector.shape_cast %42 : vector<2x256xf32> to vector<2x1x256xf32>
    %44 = vector.broadcast %43 : vector<2x1x256xf32> to vector<2x32x256xf32>
    %45 = arith.mulf %23, %44 : vector<2x32x256xf32>
    %c0_26 = arith.constant 0 : index
    %c0_27 = arith.constant 0 : index
    %c0_28 = arith.constant 0 : index
    %46 = vector.load %arg9[%c0_26, %c0_27, %c0_28] : memref<2x32x256xf32, #tpu.memory_space<vmem>>, vector<2x32x256xf32>
    tpu.vector_store %arg9[%c0_26, %c0_27, %c0_28], %45 {strides = array<i32>} : memref<2x32x256xf32, #tpu.memory_space<vmem>>, vector<2x32x256xf32>,
    return
  }
  func.func @transform_0(%arg0: i32) -> (i32, i32) {
    %c0_i32 = arith.constant 0 : i32
    %c0_i32_0 = arith.constant 0 : i32
    %c0_i32_1 = arith.constant 0 : i32
    return %c0_i32, %c0_i32_0 : i32, i32
  }
  func.func @transform_1(%arg0: i32) -> (i32, i32) {
    %c0_i32 = arith.constant 0 : i32
    %c0_i32_0 = arith.constant 0 : i32
    %c0_i32_1 = arith.constant 0 : i32
    return %c0_i32, %c0_i32_0 : i32, i32
  }
  func.func @transform_2(%arg0: i32) -> (i32, i32) {
    %c0_i32 = arith.constant 0 : i32
    %c0_i32_0 = arith.constant 0 : i32
    %c0_i32_1 = arith.constant 0 : i32
    return %c0_i32, %c0_i32_0 : i32, i32
  }
  func.func @transform_3(%arg0: i32) -> (i32, i32) {
    %c0_i32 = arith.constant 0 : i32
    %c0_i32_0 = arith.constant 0 : i32
    %c0_i32_1 = arith.constant 0 : i32
    return %c0_i32, %c0_i32_0 : i32, i32
  }
  func.func @transform_4(%arg0: i32) -> (i32, i32) {
    %c0_i32 = arith.constant 0 : i32
    %c0_i32_0 = arith.constant 0 : i32
    %c0_i32_1 = arith.constant 0 : i32
    return %c0_i32, %c0_i32_0 : i32, i32
  }
  func.func @transform_5(%arg0: i32) -> (i32, i32) {
    %c0_i32 = arith.constant 0 : i32
    %c0_i32_0 = arith.constant 0 : i32
    %c0_i32_1 = arith.constant 0 : i32
    return %c0_i32, %c0_i32_0 : i32, i32
  }
  func.func @transform_6(%arg0: i32) -> i32 {
    %c0_i32 = arith.constant 0 : i32
    %c0_i32_0 = arith.constant 0 : i32
    return %c0_i32 : i32
  }
  func.func @transform_7(%arg0: i32) -> (i32, i32, i32) {
    %c0_i32 = arith.constant 0 : i32
    %c0_i32_0 = arith.constant 0 : i32
    %c0_i32_1 = arith.constant 0 : i32
    return %arg0, %c0_i32, %c0_i32_0 : i32, i32, i32
  }
  func.func @transform_8(%arg0: i32) -> (i32, i32, i32) {
    %c0_i32 = arith.constant 0 : i32
    %c0_i32_0 = arith.constant 0 : i32
    %c0_i32_1 = arith.constant 0 : i32
    return %arg0, %c0_i32, %c0_i32_0 : i32, i32, i32
  }
}

</mosaic_0001>

<bundles_post_ra>
// kernel: tpu_custom_call.1
= control target key start
LH: loop header
LB: loop body
LE: loop exit
PB: predicated region body
PF: predicated region fallthrough
CT: control target
= control target key end

     0   :  { %14 = vsyncpa [#allocation4], 0  ;;  %s1761_s0 = inlined_call_operand.vmem [shape: f32[32,2], index: 0, kind: input, shape index: {}]   ;;  %s1762_s1 = inlined_call_operand.vmem [shape: f32[1,2], index: 1, kind: input, shape index: {}]   ;;  %s1763_s2 = inlined_call_operand.vmem [shape: f32[2,32], index: 2, kind: input, shape index: {}]   ;;  %s1764_s3 = inlined_call_operand.vmem [shape: f32[1,32], index: 3, kind: input, shape index: {}]   ;;  %s1765_s4 = inlined_call_operand.hbm [shape: bf16[256,256], index: 4, kind: input, shape index: {}]   ;;  %s1766_s5 = inlined_call_operand.hbm [shape: bf16[256,256], index: 5, kind: input, shape index: {}]   ;;  %s1767_s6 = inlined_call_operand.<no memory space> [shape: f32[1], index: 6, kind: input, shape index: {}]   ;;  %s1768_s7 = inlined_call_operand.hbm [shape: f32[2,32,256], index: 7, kind: input, shape index: {}]   ;;  %s1769_s8 = inlined_call_operand.hbm [shape: f32[2,32,256], index: 8, kind: output, shape index: {}]  }
   0x1   :  { %15 = vsyncpa [#allocation7], 0 }
   0x2   :  { %16 = vsyncpa [#allocation5], 0  ;;  %s42_s29 = sshll.u32 %s1766_s5, 4  ;;  %s1496_s30 = smov [#allocation6]   ;;  %s43_s29 = int_to_ptr.hbm [resolvable:$true] %s42_s29 }
   0x3   :  { %s44_s9 = sshll.u32 %s1496_s30, 4  ;;  %s29_s12 = sshll.u32 %s1765_s4, 4  ;;  %s45_s9 = int_to_ptr.vmem [resolvable:$true] %s44_s9  ;;  %s30_s12 = int_to_ptr.hbm [resolvable:$true] %s29_s12 }
   0x4   :  { %s1497_s13 = smov 128   ;;  %s1498_s14 = smov 8  }
   0x5   :  { %50 = dma.hbm_to_vmem [thread:$0]  %s43_s29, 4096, %s45_s9, [#allocation7], %s1497_s13, %s1497_s13, %s1498_s14  }
   0x6   :  { %s1499_s15 = smov [#allocation3]   ;;  %s57_s19 = sshll.u32 %s1768_s7, 4  ;;  %s58_s19 = int_to_ptr.hbm [resolvable:$true] %s57_s19 }
   0x7   :  { %s31_s16 = sshll.u32 %s1499_s15, 4  ;;  %s1500_s5 = smov [#allocation8]   ;;  %s32_s16 = int_to_ptr.vmem [resolvable:$true] %s31_s16 }
   0x8   :  { %37 = dma.hbm_to_vmem [thread:$0]  %s30_s12, 4096, %s32_s16, [#allocation4], %s1497_s13, %s1497_s13, %s1498_s14  }
   0x9   :  { %s59_s20 = sshll.u32 %s1500_s5, 4  ;;  %s1501_s21 = smov 256   ;;  %s60_s20 = int_to_ptr.vmem [resolvable:$true] %s59_s20 }
   0xa   :  { %s1502_s22 = smov 16  }
   0xb   :  { %65 = dma.hbm_to_vmem [thread:$0]  %s58_s19, 2048, %s60_s20, [#allocation7], %s1501_s21, %s1501_s21, %s1502_s22  }
   0xc   :  { %1490 = dma.done.wait [#allocation4], 4096  }
   0xd   :  { %1491 = vsyncadd [#allocation4], 4294963200 }
   0xe   :  { %1492 = dma.done.wait [#allocation7], 6144  }
   0xf   :  { %1493 = vsyncadd [#allocation7], 4294961152  ;;  %v1563_v0 = vld [vmem:[#allocation8 + $0x40] sm:$0xff]  ;;  %v1565_v1 = vld [vmem:[#allocation8 + $0x48] sm:$0xff]  ;;  %v1503_v25 = vmov 256.0   ;;  %v149_v36 = vlaneseq  ;;  %vm154_vm1 = vcmask 130112  }
  0x10   :  { %v1567_v2 = vld [vmem:[#allocation8] sm:$0xff]  ;;  %v106_v3 = vadd.f32 %v1565_v1, %v1563_v0  ;;  %v1571_v4 = vld [vmem:[#allocation8 + $0x8] sm:$0xff]  ;;  %v1581_v9 = vld [vmem:[#allocation8 + $0x50] sm:$0xff]  ;;  %1378 = vrcp.f32 %v1503_v25  ;;  %vm158_vm2 = vcmask 195712   ;;  %vm162_vm3 = vcmask 261312   ;;  %s1017_s14 = sshll.u32 %s1769_s8, 4  ;;  %s1018_s14 = int_to_ptr.hbm [resolvable:$true] %s1017_s14 }
  0x11   :  { %v1573_v5 = vld [vmem:[#allocation8 + $0x20] sm:$0xff]  ;;  %v1575_v6 = vld [vmem:[#allocation8 + $0x28] sm:$0xff]  ;;  %v94_v7 = vadd.f32 %v1571_v4, %v1567_v2  ;;  %v1583_v10 = vld [vmem:[#allocation8 + $0x58] sm:$0xff]  ;;  %v150_v38 = vand.u32 127, %v149_v36  ;;  %vm171_vm4 = vcmask 1041409   ;;  %vm173_vm5 = vcmask 261120  }
  0x12   :  { %v100_v8 = vadd.f32 %v1575_v6, %v1573_v5  ;;  %107 = vadd.xlane.f32.xlu1 %v106_v3  ;;  %v1585_v11 = vld [vmem:[#allocation8 + $0x10] sm:$0xff]  ;;  %v1587_v12 = vld [vmem:[#allocation8 + $0x18] sm:$0xff]  ;;  %v1589_v13 = vld [vmem:[#allocation8 + $0x60] sm:$0xff]  ;;  %v109_v15 = vadd.f32 %v1583_v10, %v1581_v9  ;;  %vm206_vm6 = vcmask 1041408   ;;  %vm202_vm7 = vcmask 15360  }
  0x13   :  { %95 = vadd.xlane.f32.xlu0 %v94_v7  ;;  %v1591_v14 = vld [vmem:[#allocation8 + $0x68] sm:$0xff]  ;;  %v97_v16 = vadd.f32 %v1587_v12, %v1585_v11  ;;  %v1599_v18 = vld [vmem:[#allocation8 + $0x70] sm:$0xff]  ;;  %v1601_v19 = vld [vmem:[#allocation8 + $0x78] sm:$0xff]  ;;  %v152_v41 = vadd.s32 4294967288, %v150_v38  ;;  %v156_v50 = vadd.s32 4294967280, %v150_v38  ;;  %v160_v54 = vadd.s32 4294967272, %v150_v38 }
  0x14   :  { %101 = vadd.xlane.f32.xlu2 %v100_v8  ;;  %v112_v17 = vadd.f32 %v1591_v14, %v1589_v13  ;;  %v1603_v20 = vld [vmem:[#allocation8 + $0x30] sm:$0xff]  ;;  %v1605_v21 = vld [vmem:[#allocation8 + $0x38] sm:$0xff]  ;;  %v115_v22 = vadd.f32 %v1601_v19, %v1599_v18  ;;  %v134_v27 = vld [vmem:[%s1761_s0 + $0x8] sm:$0xff] }
  0x15   :  { %v103_v23 = vadd.f32 %v1605_v21, %v1603_v20  ;;  %v136_v24 = vld [vmem:[%s1761_s0 + $0x18] sm:$0xff]  ;;  %v135_v26 = vld [vmem:[%s1761_s0 + $0x10] sm:$0xff]  ;;  %v133_v28 = vld [vmem:[%s1761_s0] sm:$0xff] }
  0x16   :  { %188 = vmatpush.msra.mxu0 %v136_v24  ;;  %v1379_v29 = vpop.eup %1378  ;;  %v1376_v24 = vld [vmem:[%s1762_s1] ss:$0 sm:$0xff] }
  0x17   :  { %v119_v30 = vmul.f32 256.0, %v1379_v29  ;;  %vm123_vm0 = vweird.f32 %v1379_v29 }
  0x18   :  { %189 = vmatpush.msra.mxu0 %v135_v26 }
  0x19   :  { %v120_v31 = vsub.f32 1.0, %v119_v30  ;;  %v1377_v30 = vld [vmem:[%s1764_s3] ss:$0 sm:$0xff]  ;;  %s1505_s3 = smov [#allocation9]  }
  0x1a   :  { %110 = vadd.xlane.f32.xlu1 %v109_v15  ;;  %190 = vmatpush.msra.mxu0 %v134_v27 }
  0x1b   :  { %98 = vadd.xlane.f32.xlu0 %v97_v16  ;;  %v121_v32 = vmul.f32 %v1379_v29, %v120_v31 }
  0x1c   :  { %113 = vadd.xlane.f32.xlu2 %v112_v17  ;;  %191 = vmatpush.msra.mxu0 %v133_v28  ;;  %v251_v28 = vshrl.u32 %v149_v36, 7 }
  0x1d   :  { %v122_v37 = vadd.f32 %v1379_v29, %v121_v32 }
  0x1e   :  { %1369 = vset.pattern.permute.xlu1 %v251_v28  ;;  %1367 = vset.pattern.permute.xlu2 %v251_v28 }
  0x1f   :  { %v124_v39 = vsel %vm123_vm0, %v1379_v29, %v122_v37  ;;  %v258_v29 = vadd.s32 8, %v251_v28 }
  0x21   :  { %1368 = vset.pattern.permute.xlu0 %v258_v29 }
  0x22   :  { %116 = vadd.xlane.f32.xlu1 %v115_v22 }
  0x23   :  { %104 = vadd.xlane.f32.xlu0 %v103_v23  ;;  %v197_v23 = vld [vmem:[%s1763_s2] sm:$0x3] }
  0x24   :  { %1032 = vmatpush.msk.msra.mxu1 %vm206_vm6, %v197_v23 }
  0x85   :  { %v108_v33 = vpop.xlane.xlu1 %107 }
  0x86   :  { %v96_v34 = vpop.xlane.xlu0 %95  ;;  %v129_v46 = vmul.f32 %v124_v39, %v108_v33 }
  0x87   :  { %v102_v35 = vpop.xlane.xlu2 %101  ;;  %v125_v47 = vmul.f32 %v124_v39, %v96_v34 }
  0x88   :  { %v164_v52 = vperm.slane %v129_v46, %v150_v38  ;;  %v127_v53 = vmul.f32 %v124_v39, %v102_v35 }
  0x89   :  { %v151_v55 = vperm.slane %v125_v47, %v150_v38 }
  0x8a   :  { %v157_v63 = vperm.slane %v127_v53, %v156_v50 }
  0x8d   :  { %v111_v40 = vpop.xlane.xlu1 %110 }
  0x8e   :  { %v130_v42 = vmul.f32 %v124_v39, %v111_v40  ;;  %v99_v43 = vpop.xlane.xlu0 %98 }
  0x8f   :  { %v114_v44 = vpop.xlane.xlu2 %113  ;;  %v126_v45 = vmul.f32 %v124_v39, %v99_v43 }
  0x90   :  { %v131_v48 = vmul.f32 %v124_v39, %v114_v44  ;;  %v165_v49 = vperm.slane %v130_v42, %v152_v41 }
  0x91   :  { %v153_v51 = vperm.slane %v126_v45, %v152_v41 }
  0x92   :  { %v167_v56 = vperm.slane %v131_v48, %v156_v50  ;;  %v166_v58 = vsel %vm154_vm1, %v165_v49, %v164_v52  ;;  %v264_v48 = vadd.s32 16, %v251_v28  ;;  %v270_v49 = vadd.s32 24, %v251_v28  ;;  %v1093_v50 = vld [vmem:[#allocation6 + $0x70] sm:$0xf] }
  0x93   :  { %v155_v61 = vsel %vm154_vm1, %v153_v51, %v151_v55  ;;  %v1340_v51 = vld [vmem:[#allocation6 + $0x74] sm:$0xf0]  ;;  %v1157_v52 = vld [vmem:[#allocation6 + $0xf0] sm:$0xf]  ;;  %v1339_v55 = vld [vmem:[#allocation6 + $0x74] sm:$0xf] }
  0x94   :  { %v168_v8 = vsel %vm158_vm2, %v167_v56, %v166_v58  ;;  %v159_v15 = vsel %vm158_vm2, %v157_v63, %v155_v61  ;;  %v1094_v53 = vor.u32 %v1340_v51, %v1093_v50  ;;  %v1095_v56 = vld [vmem:[#allocation6 + $0x78] sm:$0xf0]  ;;  %v1085_v61 = vld [vmem:[#allocation6 + $0x60] sm:$0xf]  ;;  %v1338_v63 = vld [vmem:[#allocation6 + $0x64] sm:$0xf0] }
  0x95   :  { %v117_v57 = vpop.xlane.xlu1 %116  ;;  %v1098_v58 = vor.u32 %v1339_v55, %v1095_v56  ;;  %v1141_v28 = vld [vmem:[#allocation6 + $0xd0] sm:$0xf]  ;;  %v1332_v51 = vld [vmem:[#allocation6 + $0x34] sm:$0xf0]  ;;  %v1331_v55 = vld [vmem:[#allocation6 + $0x34] sm:$0xf] }
  0x96   :  { %v132_v59 = vmul.f32 %v124_v39, %v117_v57  ;;  %v105_v60 = vpop.xlane.xlu0 %104  ;;  %644 = vmatpush.bf16.msra.mxu2 %v1094_v53  ;;  %v1061_v50 = vld [vmem:[#allocation6 + $0x30] sm:$0xf]  ;;  %v1063_v56 = vld [vmem:[#allocation6 + $0x38] sm:$0xf0] }
  0x97   :  { %v128_v62 = vmul.f32 %v124_v39, %v105_v60  ;;  %v1159_v60 = vld [vmem:[#allocation6 + $0xf8] sm:$0xf0]  ;;  %670 = vmatpush.bf16.msrb.mxu1 %v1098_v58  ;;  %v1062_v53 = vor.u32 %v1332_v51, %v1061_v50  ;;  %v1066_v58 = vor.u32 %v1331_v55, %v1063_v56  ;;  %v1221_v50 = vld [vmem:[#allocation3 + $0x70] sm:$0xf]  ;;  %v1324_v55 = vld [vmem:[#allocation3 + $0xf4] sm:$0xf0] }
  0x98   :  { %v169_v3 = vperm.slane %v132_v59, %v160_v54  ;;  %v1355_v59 = vld [vmem:[#allocation6 + $0xf4] sm:$0xf] }
  0x99   :  { %v161_v7 = vperm.slane %v128_v62, %v160_v54  ;;  %v1356_v54 = vld [vmem:[#allocation6 + $0xf4] sm:$0xf0]  ;;  %v1162_v62 = vor.u32 %v1355_v59, %v1159_v60  ;;  %v1347_v59 = vld [vmem:[#allocation6 + $0xb4] sm:$0xf]  ;;  %v1127_v60 = vld [vmem:[#allocation6 + $0xb8] sm:$0xf0] }
  0x9a   :  { %v170_v16 = vsel %vm162_vm3, %v169_v3, %v168_v8  ;;  %v1158_v57 = vor.u32 %v1356_v54, %v1157_v52  ;;  %v1149_v3 = vld [vmem:[#allocation6 + $0xe0] sm:$0xf]  ;;  %v1086_v8 = vor.u32 %v1338_v63, %v1085_v61  ;;  %v1125_v52 = vld [vmem:[#allocation6 + $0xb0] sm:$0xf]  ;;  %v1348_v54 = vld [vmem:[#allocation6 + $0xb4] sm:$0xf0]  ;;  %v1130_v61 = vor.u32 %v1347_v59, %v1127_v60 }
  0x9b   :  { %v163_v17 = vsel %vm162_vm3, %v161_v7, %v159_v15  ;;  %v1354_v7 = vld [vmem:[#allocation6 + $0xe4] sm:$0xf0]  ;;  %683 = vmatpush.bf16.msrb.mxu0 %v1162_v62  ;;  %v1053_v62 = vld [vmem:[#allocation6 + $0x20] sm:$0xf]  ;;  %v1223_v59 = vld [vmem:[#allocation3 + $0x78] sm:$0xf0] }
  0x9c   :  { %v172_v22 = vsel %vm171_vm4, %v170_v16, %v163_v17  ;;  %657 = vmatpush.bf16.msra.mxu3 %v1158_v57  ;;  %v1150_v15 = vor.u32 %v1354_v7, %v1149_v3  ;;  %v1337_v16 = vld [vmem:[#allocation6 + $0x64] sm:$0xf]  ;;  %v1087_v17 = vld [vmem:[#allocation6 + $0x68] sm:$0xf0]  ;;  %645 = vmatpush.bf16.msra.mxu2 %v1086_v8  ;;  %v1126_v57 = vor.u32 %v1348_v54, %v1125_v52  ;;  %v1330_v63 = vld [vmem:[#allocation6 + $0x24] sm:$0xf0] }
  0x9d   :  { %1031 = vmatmul.msk.f32.vlgmr.msra.gmra.mxu0 %vm173_vm5, %v172_v22  ;;  %v1353_v22 = vld [vmem:[#allocation6 + $0xe4] sm:$0xf]  ;;  %v1090_v23 = vor.u32 %v1337_v16, %v1087_v17  ;;  %v1117_v3 = vld [vmem:[#allocation6 + $0xa0] sm:$0xf]  ;;  %v1054_v7 = vor.u32 %v1330_v63, %v1053_v62  ;;  %v1346_v8 = vld [vmem:[#allocation6 + $0xa4] sm:$0xf0] }
  0x9e   :  { %v1055_v16 = vld [vmem:[#allocation6 + $0x28] sm:$0xf0]  ;;  %v1118_v17 = vor.u32 %v1346_v8, %v1117_v3  ;;  %v1285_v54 = vld [vmem:[#allocation3 + $0xf0] sm:$0xf]  ;;  %v1323_v60 = vld [vmem:[#allocation3 + $0xf4] sm:$0xf] }
  0x9f   :  { %671 = vmatpush.bf16.msrb.mxu1 %v1090_v23  ;;  %v1345_v23 = vld [vmem:[#allocation6 + $0xa4] sm:$0xf]  ;;  %v1287_v62 = vld [vmem:[#allocation3 + $0xf8] sm:$0xf0]  ;;  %v1213_v63 = vld [vmem:[#allocation3 + $0x60] sm:$0xf] }
  0xa0   :  { %658 = vmatpush.bf16.msra.mxu3 %v1150_v15  ;;  %v1329_v15 = vld [vmem:[#allocation6 + $0x24] sm:$0xf]  ;;  %v1306_v3 = vld [vmem:[#allocation3 + $0x64] sm:$0xf0]  ;;  %vm967_vm5 = vcmask 1040384  }
  0xa1   :  { %v1322_v8 = vld [vmem:[#allocation3 + $0xe4] sm:$0xf0] }
 0x11a   :  { %v193_v25 = vpop.f32.mrf.mxu0 }
 0x11b   :  { %v194_v26 = vadd.f32 %v1376_v24, %v193_v25  ;;  %v1151_v24 = vld [vmem:[#allocation6 + $0xe8] sm:$0xf0] }
 0x11c   :  { %v1154_v25 = vor.u32 %v1353_v22, %v1151_v24  ;;  %v1058_v22 = vor.u32 %v1329_v15, %v1055_v16  ;;  %v1119_v24 = vld [vmem:[#allocation6 + $0xa8] sm:$0xf0]  ;;  %v1305_v15 = vld [vmem:[#allocation3 + $0x64] sm:$0xf]  ;;  %v1290_v16 = vor.u32 %v1323_v60, %v1287_v62 }
 0x11d   :  { %v196_v27 = vmax.f32 %v194_v26, 0.0  ;;  %v1077_v26 = vld [vmem:[#allocation6 + $0x50] sm:$0xf] }
 0x11e   :  { %684 = vmatpush.bf16.msrb.mxu0 %v1154_v25 }
 0x11f   :  { %1033 = vmatmul.msk.f32.vlgmr.msra.gmra.mxu1 %vm202_vm7, %v196_v27  ;;  %v1336_v27 = vld [vmem:[#allocation6 + $0x54] sm:$0xf0] }
 0x19c   :  { %v227_v31 = vpop.f32.mrf.mxu1 }
 0x19d   :  { %v228_v32 = vadd.f32 %v1377_v30, %v227_v31  ;;  %v1352_v30 = vld [vmem:[#allocation6 + $0xd4] sm:$0xf0]  ;;  %v1335_v31 = vld [vmem:[#allocation6 + $0x54] sm:$0xf] }
 0x19f   :  { %v1034_v33 = vmul.f32 -1.442695, %v228_v32  ;;  %v1079_v32 = vld [vmem:[#allocation6 + $0x58] sm:$0xf0] }
 0x1a1   :  { %1380 = vpow2.f32 %v1034_v33  ;;  %v1142_v33 = vor.u32 %v1352_v30, %v1141_v28  ;;  %v1328_v28 = vld [vmem:[#allocation6 + $0x14] sm:$0xf0] }
 0x1a2   :  { %v1344_v30 = vld [vmem:[#allocation6 + $0x94] sm:$0xf0] }
 0x1a3   :  { %659 = vmatpush.bf16.msra.mxu3 %v1142_v33  ;;  %v1343_v33 = vld [vmem:[#allocation6 + $0x94] sm:$0xf] }
 0x1a7   :  { %v1381_v34 = vpop.eup %1380 }
 0x1a8   :  { %v233_v35 = vadd.f32 1.0, %v1381_v34  ;;  %v1082_v34 = vor.u32 %v1335_v31, %v1079_v32  ;;  %v1327_v31 = vld [vmem:[#allocation6 + $0x14] sm:$0xf]  ;;  %v1047_v32 = vld [vmem:[#allocation6 + $0x18] sm:$0xf0] }
 0x1aa   :  { %1382 = vrcp.f32 %v233_v35  ;;  %v245_v40 = vand.u32 2147483648, %v233_v35  ;;  %v243_v41 = vand.u32 2147483647, %v233_v35  ;;  %vm239_vm9 = vweird.f32 %v233_v35  ;;  %672 = vmatpush.bf16.msrb.mxu1 %v1082_v34  ;;  %v1111_v34 = vld [vmem:[#allocation6 + $0x98] sm:$0xf0] }
 0x1ac   :  { %v246_v43 = vor.u32 1.1754944e-38, %v245_v40  ;;  %vm244_vm11 = vcmp.eq.f32.partialorder %v243_v41, 8.507059e+37  ;;  %v1334_v40 = vld [vmem:[#allocation6 + $0x44] sm:$0xf0] }
 0x1ad   :  { %v1350_v41 = vld [vmem:[#allocation6 + $0xc4] sm:$0xf0] }
 0x1b0   :  { %v1383_v37 = vpop.eup %1382 }
 0x1b1   :  { %v235_v38 = vmul.f32 %v1383_v37, %v233_v35  ;;  %vm240_vm8 = vweird.f32 %v1383_v37  ;;  %v1351_v35 = vld [vmem:[#allocation6 + $0xd4] sm:$0xf] }
 0x1b2   :  { %vm241_vm10 = vmor %vm239_vm9, %vm240_vm8 }
 0x1b3   :  { %v236_v39 = vsub.f32 1.0, %v235_v38  ;;  %v1069_v38 = vld [vmem:[#allocation6 + $0x40] sm:$0xf] }
 0x1b5   :  { %v237_v36 = vmul.f32 %v1383_v37, %v236_v39 }
 0x1b7   :  { %v238_v42 = vadd.f32 %v1383_v37, %v237_v36  ;;  %v1133_v36 = vld [vmem:[#allocation6 + $0xc0] sm:$0xf] }
 0x1b9   :  { %v242_v44 = vsel %vm241_vm10, %v1383_v37, %v238_v42  ;;  %v1143_v37 = vld [vmem:[#allocation6 + $0xd8] sm:$0xf0]  ;;  %v1070_v42 = vor.u32 %v1334_v40, %v1069_v38  ;;  %v1050_v38 = vor.u32 %v1327_v31, %v1047_v32  ;;  %v1037_v40 = vld [vmem:[#allocation6] sm:$0xf]  ;;  %v1205_v32 = vld [vmem:[#allocation3 + $0x50] sm:$0xf] }
 0x1ba   :  { %v247_v45 = vsel %vm244_vm11, %v246_v43, %v242_v44  ;;  %v1146_v39 = vor.u32 %v1351_v35, %v1143_v37  ;;  %v1134_v43 = vor.u32 %v1350_v41, %v1133_v36  ;;  %v1333_v44 = vld [vmem:[#allocation6 + $0x44] sm:$0xf]  ;;  %v1326_v36 = vld [vmem:[#allocation6 + $0x4] sm:$0xf0]  ;;  %v1101_v41 = vld [vmem:[#allocation6 + $0x80] sm:$0xf] }
 0x1bb   :  { %v274_v46 = vperm.slane %v247_v45, 1  ;;  %v249_v47 = vperm.slane %v247_v45, 0  ;;  %v1071_v45 = vld [vmem:[#allocation6 + $0x48] sm:$0xf0] }
 0x1bc   :  { %685 = vmatpush.bf16.msrb.mxu0 %v1146_v39  ;;  %660 = vmatpush.bf16.msra.mxu3 %v1134_v43  ;;  %v1114_v39 = vor.u32 %v1343_v33, %v1111_v34  ;;  %v1342_v43 = vld [vmem:[#allocation6 + $0x84] sm:$0xf0]  ;;  %v1304_v33 = vld [vmem:[#allocation3 + $0x54] sm:$0xf0]  ;;  %v1269_v34 = vld [vmem:[#allocation3 + $0xd0] sm:$0xf] }
 0x1bd   :  { %279 = vperm.xlu1 %1369, %v274_v46   ;;  %260 = vperm.xlu0 %1368, %v249_v47  }
 0x1be   :  { %254 = vperm.xlu2 %1367, %v249_v47  }
 0x1c0   :  { %661 = vmatpush.bf16.msra.mxu3 %v1126_v57  ;;  %v1286_v57 = vor.u32 %v1324_v55, %v1285_v54  ;;  %v1199_v54 = vld [vmem:[#allocation3 + $0x48] sm:$0xf0] }
 0x1c4   :  { %662 = vmatpush.bf16.msra.mxu3 %v1118_v17  ;;  %v1214_v17 = vor.u32 %v1306_v3, %v1213_v63 }
 0x1c5   :  { %1372 = vset.pattern.permute.xlu1 %v264_v48  ;;  %1375 = vset.pattern.permute.xlu0 %v270_v49 }
 0x1c6   :  { %1370 = vset.pattern.permute.xlu2 %v258_v29  ;;  %v1078_v29 = vor.u32 %v1336_v27, %v1077_v26  ;;  %v1122_v26 = vor.u32 %v1345_v23, %v1119_v24  ;;  %v1045_v27 = vld [vmem:[#allocation6 + $0x10] sm:$0xf]  ;;  %v1321_v23 = vld [vmem:[#allocation3 + $0xe4] sm:$0xf]  ;;  %v1279_v24 = vld [vmem:[#allocation3 + $0xe8] sm:$0xf0] }
 0x1c7   :  { %v1046_v35 = vor.u32 %v1328_v28, %v1045_v27  ;;  %v1282_v31 = vor.u32 %v1321_v23, %v1279_v24  ;;  %v1191_v24 = vld [vmem:[#allocation3 + $0x38] sm:$0xf0] }
 0x1c8   :  { %646 = vmatpush.bf16.msra.mxu2 %v1078_v29  ;;  %v1109_v29 = vld [vmem:[#allocation6 + $0x90] sm:$0xf] }
 0x1c9   :  { %v1110_v37 = vor.u32 %v1344_v30, %v1109_v29 }
 0x1cb   :  { %663 = vmatpush.bf16.msra.mxu3 %v1110_v37  ;;  %v1303_v37 = vld [vmem:[#allocation3 + $0x54] sm:$0xf] }
 0x1cc   :  { %647 = vmatpush.bf16.msra.mxu2 %v1070_v42  ;;  %v1038_v42 = vor.u32 %v1326_v36, %v1037_v40 }
 0x1cd   :  { %291 = vperm.xlu1 %1372, %v274_v46  }
 0x1ce   :  { %285 = vperm.xlu2 %1370, %v274_v46  }
 0x1d0   :  { %648 = vmatpush.bf16.msra.mxu2 %v1062_v53  ;;  %v1308_v53 = vld [vmem:[#allocation3 + $0x74] sm:$0xf0] }
 0x1d1   :  { %v1222_v56 = vor.u32 %v1308_v53, %v1221_v50  ;;  %v1301_v53 = vld [vmem:[#allocation3 + $0x44] sm:$0xf] }
 0x1d4   :  { %649 = vmatpush.bf16.msra.mxu2 %v1054_v7  ;;  %v1277_v7 = vld [vmem:[#allocation3 + $0xe0] sm:$0xf] }
 0x1d5   :  { %1374 = vset.pattern.permute.xlu1 %v270_v49  ;;  %v1278_v29 = vor.u32 %v1322_v8, %v1277_v7  ;;  %v1189_v8 = vld [vmem:[#allocation3 + $0x30] sm:$0xf] }
 0x1d6   :  { %1371 = vset.pattern.permute.xlu2 %v264_v48  ;;  %v1135_v48 = vld [vmem:[#allocation6 + $0xc8] sm:$0xf0] }
 0x1d8   :  { %650 = vmatpush.bf16.msra.mxu2 %v1046_v35  ;;  %v1320_v35 = vld [vmem:[#allocation3 + $0xd4] sm:$0xf0] }
 0x1dc   :  { %651 = vmatpush.bf16.msra.mxu2 %v1038_v42  ;;  %v1319_v42 = vld [vmem:[#allocation3 + $0xd4] sm:$0xf] }
 0x1dd   :  { %297 = vperm.xlu1 %1374, %v274_v46   ;;  %v1349_v46 = vld [vmem:[#allocation6 + $0xc4] sm:$0xf] }
 0x1de   :  { %266 = vperm.xlu2 %1371, %v249_v47  }
 0x1e0   :  { %870 = vmatpush.bf16.msrb.mxu2 %v1222_v56 }
 0x1e4   :  { %871 = vmatpush.bf16.msrb.mxu2 %v1214_v17 }
 0x1e6   :  { %1373 = vset.pattern.permute.xlu2 %v270_v49  ;;  %v1138_v49 = vor.u32 %v1349_v46, %v1135_v48  ;;  %v1102_v46 = vor.u32 %v1342_v43, %v1101_v41  ;;  %v1341_v48 = vld [vmem:[#allocation6 + $0x84] sm:$0xf]  ;;  %v1206_v41 = vor.u32 %v1304_v33, %v1205_v32  ;;  %v1271_v43 = vld [vmem:[#allocation3 + $0xd8] sm:$0xf0]  ;;  %v1181_v33 = vld [vmem:[#allocation3 + $0x20] sm:$0xf] }
 0x1e7   :  { %v1274_v50 = vor.u32 %v1319_v42, %v1271_v43  ;;  %v1255_v32 = vld [vmem:[#allocation3 + $0xb8] sm:$0xf0] }
 0x1e8   :  { %686 = vmatpush.bf16.msrb.mxu0 %v1138_v49  ;;  %v1103_v49 = vld [vmem:[#allocation6 + $0x88] sm:$0xf0]  ;;  %664 = vmatpush.bf16.msra.mxu3 %v1102_v46  ;;  %v1197_v46 = vld [vmem:[#allocation3 + $0x40] sm:$0xf] }
 0x1e9   :  { %v1106_v52 = vor.u32 %v1341_v48, %v1103_v49  ;;  %v1261_v48 = vld [vmem:[#allocation3 + $0xc0] sm:$0xf]  ;;  %872 = vmatpush.bf16.msrb.mxu2 %v1206_v41 }
 0x1ec   :  { %687 = vmatpush.bf16.msrb.mxu0 %v1130_v61  ;;  %883 = vmatpush.bf16.msrb.mxu3 %v1286_v57 }
 0x1ee   :  { %272 = vperm.xlu2 %1373, %v249_v47   ;;  %v1074_v47 = vor.u32 %v1333_v44, %v1071_v45  ;;  %v1325_v44 = vld [vmem:[#allocation6 + $0x4] sm:$0xf]  ;;  %v1039_v45 = vld [vmem:[#allocation6 + $0x8] sm:$0xf0] }
 0x1f0   :  { %673 = vmatpush.bf16.msrb.mxu1 %v1074_v47  ;;  %688 = vmatpush.bf16.msrb.mxu0 %v1122_v26  ;;  %v1042_v47 = vor.u32 %v1325_v44, %v1039_v45  ;;  %v1504_v26 = vmov 32.0   ;;  %v1270_v44 = vor.u32 %v1320_v35, %v1269_v34 }
 0x1f1   :  { %1384 = vrcp.f32 %v1504_v26  ;;  %884 = vmatpush.bf16.msrb.mxu3 %v1278_v29 }
 0x1f4   :  { %674 = vmatpush.bf16.msrb.mxu1 %v1066_v58  ;;  %689 = vmatpush.bf16.msrb.mxu0 %v1114_v39  ;;  %v1307_v58 = vld [vmem:[#allocation3 + $0x74] sm:$0xf] }
 0x1f5   :  { %v1226_v61 = vor.u32 %v1307_v58, %v1223_v59  ;;  %v1263_v58 = vld [vmem:[#allocation3 + $0xc8] sm:$0xf0]  ;;  %885 = vmatpush.bf16.msrb.mxu3 %v1270_v44  ;;  %v1297_v44 = vld [vmem:[#allocation3 + $0x24] sm:$0xf] }
 0x1f7   :  { %v1643_v49 = vpop.eup %1384 }
 0x1f8   :  { %675 = vmatpush.bf16.msrb.mxu1 %v1058_v22  ;;  %690 = vmatpush.bf16.msrb.mxu0 %v1106_v52  ;;  %v1215_v22 = vld [vmem:[#allocation3 + $0x68] sm:$0xf0]  ;;  %v1318_v52 = vld [vmem:[#allocation3 + $0xc4] sm:$0xf0]  ;;  %v1673_v62 = vmul.f32 32.0, %v1643_v49  ;;  %vm356_vm12 = vweird.f32 %v1643_v49 }
 0x1f9   :  { %v1218_v30 = vor.u32 %v1305_v15, %v1215_v22  ;;  %v1300_v15 = vld [vmem:[#allocation3 + $0x34] sm:$0xf0] }
 0x1fa   :  { %v1190_v29 = vor.u32 %v1300_v15, %v1189_v8 }
 0x1fc   :  { %676 = vmatpush.bf16.msrb.mxu1 %v1050_v38  ;;  %909 = vmatpush.bf16.msra.mxu0 %v1290_v16  ;;  %v1207_v38 = vld [vmem:[#allocation3 + $0x58] sm:$0xf0]  ;;  %v1253_v16 = vld [vmem:[#allocation3 + $0xb0] sm:$0xf] }
 0x1fd   :  { %v1210_v45 = vor.u32 %v1303_v37, %v1207_v38  ;;  %v1298_v38 = vld [vmem:[#allocation3 + $0x24] sm:$0xf0] }
 0x200   :  { %677 = vmatpush.bf16.msrb.mxu1 %v1042_v47  ;;  %v1302_v47 = vld [vmem:[#allocation3 + $0x44] sm:$0xf0]  ;;  %910 = vmatpush.bf16.msra.mxu0 %v1282_v31  ;;  %v1315_v31 = vld [vmem:[#allocation3 + $0xb4] sm:$0xf] }
 0x204   :  { %896 = vmatpush.bf16.msra.mxu1 %v1226_v61  ;;  %v1202_v61 = vor.u32 %v1301_v53, %v1199_v54  ;;  %911 = vmatpush.bf16.msra.mxu0 %v1274_v50  ;;  %v1173_v53 = vld [vmem:[#allocation3 + $0x10] sm:$0xf]  ;;  %v1296_v54 = vld [vmem:[#allocation3 + $0x14] sm:$0xf0] }
 0x208   :  { %897 = vmatpush.bf16.msra.mxu1 %v1218_v30 }
 0x20c   :  { %898 = vmatpush.bf16.msra.mxu1 %v1210_v45  ;;  %v1313_v45 = vld [vmem:[#allocation3 + $0xa4] sm:$0xf] }
 0x210   :  { %899 = vmatpush.bf16.msra.mxu1 %v1202_v61 }
 0x218   :  { %v1633_v25 = vpop.permute.xlu2 %254 }
 0x228   :  { %v1635_v51 = vpop.permute.xlu2 %285 }
 0x22f   :  { %v280_v27 = vpop.permute.xlu1 %279  ;;  %v261_v28 = vpop.permute.xlu0 %260 }
 0x230   :  { %v1638_v39 = vmul.f32 %v261_v28, %v1585_v11  ;;  %v1641_v40 = vmul.f32 %v261_v28, %v1587_v12  ;;  %v1647_v11 = vmul.f32 %v1633_v25, %v1567_v2  ;;  %v1651_v12 = vmul.f32 %v1633_v25, %v1571_v4  ;;  %v1317_v2 = vld [vmem:[#allocation3 + $0xc4] sm:$0xf] }
 0x231   :  { %v1654_v55 = vmul.f32 %v280_v27, %v1563_v0  ;;  %v1664_v4 = vmul.f32 %v1635_v51, %v1581_v9  ;;  %v1198_v0 = vor.u32 %v1302_v47, %v1197_v46  ;;  %v1677_v9 = vmul.f32 %v1635_v51, %v1583_v10  ;;  %v1316_v51 = vld [vmem:[#allocation3 + $0xb4] sm:$0xf0] }
 0x232   :  { %v315_v25 = vadd.f32 %v1638_v39, %v1647_v11  ;;  %v324_v59 = vadd.f32 %v1641_v40, %v1651_v12  ;;  %v1680_v63 = vmul.f32 %v280_v27, %v1565_v1  ;;  %v371_v3 = vmax.f32 %v1651_v12, %v1641_v40  ;;  %v1299_v1 = vld [vmem:[#allocation3 + $0x34] sm:$0xf] }
 0x233   :  { %v1266_v7 = vor.u32 %v1317_v2, %v1263_v58  ;;  %v333_v17 = vadd.f32 %v1664_v4, %v1654_v55  ;;  %873 = vmatpush.bf16.msrb.mxu2 %v1198_v0  ;;  %v1254_v30 = vor.u32 %v1316_v51, %v1253_v16  ;;  %v1194_v37 = vor.u32 %v1299_v1, %v1191_v24  ;;  %v1312_v0 = vld [vmem:[#allocation3 + $0x94] sm:$0xf0] }
 0x234   :  { %v342_v41 = vadd.f32 %v1677_v9, %v1680_v63  ;;  %v380_v42 = vmax.f32 %v1654_v55, %v1664_v4  ;;  %v1182_v58 = vor.u32 %v1298_v38, %v1181_v33  ;;  %v1294_v33 = vld [vmem:[#allocation3 + $0x4] sm:$0xf0] }
 0x235   :  { %912 = vmatpush.bf16.msra.mxu0 %v1266_v7  ;;  %900 = vmatpush.bf16.msra.mxu1 %v1194_v37  ;;  %v1175_v7 = vld [vmem:[#allocation3 + $0x18] sm:$0xf0] }
 0x237   :  { %874 = vmatpush.bf16.msrb.mxu2 %v1190_v29 }
 0x238   :  { %v267_v36 = vpop.permute.xlu2 %266 }
 0x239   :  { %v1657_v56 = vmul.f32 %v267_v36, %v1573_v5  ;;  %v1660_v57 = vmul.f32 %v267_v36, %v1575_v6  ;;  %v362_v5 = vmax.f32 %v1647_v11, %v1638_v39  ;;  %v1262_v6 = vor.u32 %v1318_v52, %v1261_v48  ;;  %v1245_v36 = vld [vmem:[#allocation3 + $0xa0] sm:$0xf]  ;;  %v1247_v52 = vld [vmem:[#allocation3 + $0xa8] sm:$0xf0] }
 0x23b   :  { %v316_v22 = vadd.f32 %v315_v25, %v1657_v56  ;;  %v325_v23 = vadd.f32 %v324_v59, %v1660_v57  ;;  %v363_v10 = vmax.f32 %v362_v5, %v1657_v56  ;;  %v372_v26 = vmax.f32 %v371_v3, %v1660_v57  ;;  %886 = vmatpush.bf16.msrb.mxu3 %v1262_v6  ;;  %v1237_v59 = vld [vmem:[#allocation3 + $0x90] sm:$0xf]  ;;  %v1295_v5 = vld [vmem:[#allocation3 + $0x14] sm:$0xf] }
 0x23c   :  { %875 = vmatpush.bf16.msrb.mxu2 %v1182_v58 }
 0x23f   :  { %v292_v60 = vpop.permute.xlu1 %291  ;;  %887 = vmatpush.bf16.msrb.mxu3 %v1254_v30  ;;  %v1238_v30 = vor.u32 %v1312_v0, %v1237_v59  ;;  %v1310_v0 = vld [vmem:[#allocation3 + $0x84] sm:$0xf0] }
 0x240   :  { %v1691_v27 = vmul.f32 %v292_v60, %v1589_v13  ;;  %v1314_v13 = vld [vmem:[#allocation3 + $0xa4] sm:$0xf0]  ;;  %v1704_v43 = vmul.f32 %v292_v60, %v1591_v14  ;;  %v389_v14 = vmax.f32 %v1680_v63, %v1677_v9 }
 0x241   :  { %v1246_v25 = vor.u32 %v1314_v13, %v1245_v36 }
 0x242   :  { %v334_v2 = vadd.f32 %v333_v17, %v1691_v27  ;;  %v343_v8 = vadd.f32 %v342_v41, %v1704_v43  ;;  %v381_v15 = vmax.f32 %v380_v42, %v1691_v27  ;;  %v390_v16 = vmax.f32 %v389_v14, %v1704_v43  ;;  %v1229_v14 = vld [vmem:[#allocation3 + $0x80] sm:$0xf] }
 0x243   :  { %v1250_v17 = vor.u32 %v1313_v45, %v1247_v52  ;;  %888 = vmatpush.bf16.msrb.mxu3 %v1246_v25 }
 0x247   :  { %889 = vmatpush.bf16.msrb.mxu3 %v1238_v30 }
 0x248   :  { %v273_v28 = vpop.permute.xlu2 %272 }
 0x249   :  { %v1694_v34 = vmul.f32 %v273_v28, %v1603_v20  ;;  %v1697_v35 = vmul.f32 %v273_v28, %v1605_v21  ;;  %v1258_v20 = vor.u32 %v1315_v31, %v1255_v32  ;;  %v1183_v21 = vld [vmem:[#allocation3 + $0x28] sm:$0xf0]  ;;  %v1178_v31 = vor.u32 %v1295_v5, %v1175_v7  ;;  %v1165_v32 = vld [vmem:[#allocation3] sm:$0xf] }
 0x24a   :  { %v1186_v3 = vor.u32 %v1297_v44, %v1183_v21  ;;  %v1166_v45 = vor.u32 %v1294_v33, %v1165_v32  ;;  %v1167_v5 = vld [vmem:[#allocation3 + $0x8] sm:$0xf0] }
 0x24b   :  { %v317_v46 = vadd.f32 %v316_v22, %v1694_v34  ;;  %v326_v47 = vadd.f32 %v325_v23, %v1697_v35  ;;  %v364_v48 = vmax.f32 %v363_v10, %v1694_v34  ;;  %v373_v50 = vmax.f32 %v372_v26, %v1697_v35  ;;  %913 = vmatpush.bf16.msra.mxu0 %v1258_v20  ;;  %v1311_v22 = vld [vmem:[#allocation3 + $0x94] sm:$0xf]  ;;  %v1239_v23 = vld [vmem:[#allocation3 + $0x98] sm:$0xf0] }
 0x24c   :  { %v1174_v26 = vor.u32 %v1296_v54, %v1173_v53  ;;  %901 = vmatpush.bf16.msra.mxu1 %v1186_v3  ;;  %v1242_v13 = vor.u32 %v1311_v22, %v1239_v23  ;;  %v353_v3 = vsub.f32 1.0, %v1673_v62 }
 0x24d   :  { %v318_v60 = vrot.slane %v317_v46, 4  ;;  %v365_v6 = vrot.slane %v364_v48, 4  ;;  %v374_v61 = vrot.slane %v373_v50, 4  ;;  %v327_v10 = vrot.slane %v326_v47, 4 }
 0x24e   :  { %876 = vmatpush.bf16.msrb.mxu2 %v1174_v26 }
 0x24f   :  { %v366_v51 = vmax.f32 %v364_v48, %v365_v6  ;;  %v375_v1 = vmax.f32 %v373_v50, %v374_v61  ;;  %v298_v24 = vpop.permute.xlu1 %297  ;;  %v319_v37 = vadd.f32 %v318_v60, %v317_v46  ;;  %914 = vmatpush.bf16.msra.mxu0 %v1250_v17  ;;  %v328_v20 = vadd.f32 %v327_v10, %v326_v47  ;;  %v1293_v47 = vld [vmem:[#allocation3 + $0x4] sm:$0xf]  ;;  %v1231_v17 = vld [vmem:[#allocation3 + $0x88] sm:$0xf0] }
 0x250   :  { %v1717_v28 = vmul.f32 %v298_v24, %v1599_v18  ;;  %v1720_v29 = vmul.f32 %v298_v24, %v1601_v19  ;;  %902 = vmatpush.bf16.msra.mxu1 %v1178_v31  ;;  %v1309_v61 = vld [vmem:[#allocation3 + $0x84] sm:$0xf]  ;;  %v1230_v10 = vor.u32 %v1310_v0, %v1229_v14 }
 0x251   :  { %v367_v38 = vrot.slane %v366_v51, 2  ;;  %v376_v36 = vrot.slane %v375_v1, 2  ;;  %v320_v60 = vrot.slane %v319_v37, 2  ;;  %v329_v6 = vrot.slane %v328_v20, 2 }
 0x252   :  { %v335_v41 = vadd.f32 %v334_v2, %v1717_v28  ;;  %v344_v42 = vadd.f32 %v343_v8, %v1720_v29  ;;  %v382_v18 = vmax.f32 %v381_v15, %v1717_v28  ;;  %v391_v19 = vmax.f32 %v390_v16, %v1720_v29  ;;  %877 = vmatpush.bf16.msrb.mxu2 %v1166_v45 }
 0x253   :  { %v368_v44 = vmax.f32 %v366_v51, %v367_v38  ;;  %v377_v21 = vmax.f32 %v375_v1, %v376_v36  ;;  %915 = vmatpush.bf16.msra.mxu0 %v1242_v13  ;;  %v1170_v51 = vor.u32 %v1293_v47, %v1167_v5  ;;  %890 = vmatpush.bf16.msrb.mxu3 %v1230_v10 }
 0x254   :  { %v336_v48 = vrot.slane %v335_v41, 4  ;;  %v345_v46 = vrot.slane %v344_v42, 4  ;;  %v383_v50 = vrot.slane %v382_v18, 4  ;;  %v392_v52 = vrot.slane %v391_v19, 4 }
 0x255   :  { %v369_v53 = vrot.slane %v368_v44, 1  ;;  %v378_v54 = vrot.slane %v377_v21, 1  ;;  %903 = vmatpush.bf16.msra.mxu1 %v1170_v51  ;;  %v1234_v31 = vor.u32 %v1309_v61, %v1231_v17  ;;  %v321_v32 = vadd.f32 %v320_v60, %v319_v37 }
 0x256   :  { %v337_v2 = vadd.f32 %v336_v48, %v335_v41  ;;  %v346_v58 = vadd.f32 %v345_v46, %v344_v42  ;;  %v384_v25 = vmax.f32 %v382_v18, %v383_v50  ;;  %v393_v59 = vmax.f32 %v391_v19, %v392_v52 }
 0x257   :  { %v370_v22 = vmax.f32 %v368_v44, %v369_v53  ;;  %v379_v23 = vmax.f32 %v377_v21, %v378_v54  ;;  %v330_v33 = vadd.f32 %v329_v6, %v328_v20  ;;  %916 = vmatpush.bf16.msra.mxu0 %v1234_v31  ;;  %v354_v41 = vmul.f32 %v1643_v49, %v353_v3 }
 0x258   :  { %v338_v7 = vrot.slane %v337_v2, 2  ;;  %v347_v8 = vrot.slane %v346_v58, 2  ;;  %v385_v15 = vrot.slane %v384_v25, 2  ;;  %v394_v16 = vrot.slane %v393_v59, 2 }
 0x259   :  { %v434_v36 = vpack.c.bf16 %v370_v22, %v370_v22  ;;  %v435_v13 = vpack.c.bf16 %v379_v23, %v379_v23  ;;  %v322_v21 = vrot.slane %v321_v32, 1  ;;  %v331_v45 = vrot.slane %v330_v33, 1 }
 0x25a   :  { %v339_v1 = vadd.f32 %v338_v7, %v337_v2  ;;  %v348_v24 = vadd.f32 %v347_v8, %v346_v58  ;;  %v386_v26 = vmax.f32 %v384_v25, %v385_v15  ;;  %v395_v30 = vmax.f32 %v393_v59, %v394_v16 }
 0x25b   :  { %v474_v50 = vunpack.c.l.b16 %v434_v36  ;;  %v475_v52 = vunpack.c.l.b16 %v435_v13  ;;  %v355_v37 = vadd.f32 %v1643_v49, %v354_v41  ;;  %v323_v2 = vadd.f32 %v322_v21, %v321_v32 }
 0x25c   :  { %v387_v62 = vrot.slane %v386_v26, 1  ;;  %v396_v38 = vrot.slane %v395_v30, 1  ;;  %v340_v42 = vrot.slane %v339_v1, 1  ;;  %v349_v18 = vrot.slane %v348_v24, 1 }
 0x25d   :  { %v332_v58 = vadd.f32 %v331_v45, %v330_v33  ;;  %v357_v5 = vsel %vm356_vm12, %v1643_v49, %v355_v37 }
 0x25e   :  { %v388_v19 = vmax.f32 %v386_v26, %v387_v62  ;;  %v397_v44 = vmax.f32 %v395_v30, %v396_v38  ;;  %v341_v20 = vadd.f32 %v340_v42, %v339_v1  ;;  %v350_v53 = vadd.f32 %v349_v18, %v348_v24 }
 0x25f   :  { %v358_v61 = vmul.f32 %v357_v5, %v323_v2  ;;  %v359_v3 = vmul.f32 %v357_v5, %v332_v58 }
 0x260   :  { %v436_v48 = vpack.c.bf16 %v388_v19, %v388_v19  ;;  %v437_v46 = vpack.c.bf16 %v397_v44, %v397_v44  ;;  %v360_v60 = vmul.f32 %v357_v5, %v341_v20  ;;  %v361_v6 = vmul.f32 %v357_v5, %v350_v53 }
 0x261   :  { %v398_v15 = vpack.c.bf16 %v358_v61, %v358_v61  ;;  %v399_v16 = vpack.c.bf16 %v359_v3, %v359_v3  ;;  %v923_v19 = vstv %s1767_s6  ;;  %s1015_s6 = sshll.u32 %s1505_s3, 4  ;;  %s1016_s6 = int_to_ptr.vmem [resolvable:$true] %s1015_s6 }
 0x262   :  { %v476_v54 = vunpack.c.l.b16 %v436_v48  ;;  %v477_v14 = vunpack.c.l.b16 %v437_v46  ;;  %v400_v7 = vpack.c.bf16 %v360_v60, %v360_v60  ;;  %v401_v8 = vpack.c.bf16 %v361_v6, %v361_v6 }
 0x263   :  { %v700_v23 = vunpack.c.l.b16 %v398_v15  ;;  %v701_v10 = vunpack.c.l.b16 %v399_v16 }
 0x264   :  { %v478_v25 = vsel %vm171_vm4, %v476_v54, %v474_v50  ;;  %v479_v59 = vsel %vm171_vm4, %v477_v14, %v475_v52  ;;  %v702_v17 = vunpack.c.l.b16 %v400_v7  ;;  %v703_v22 = vunpack.c.l.b16 %v401_v8 }
 0x265   :  { %v480_v0 = vpack.c.b16 %v478_v25, %v478_v25  ;;  %v481_v47 = vpack.c.b16 %v479_v59, %v479_v59 }
 0x266   :  { %v704_v51 = vsel %vm171_vm4, %v702_v17, %v700_v23  ;;  %v705_v49 = vsel %vm171_vm4, %v703_v22, %v701_v10 }
 0x267   :  { %652 = vmatmul.bf16.vlgmr.msra.gmra.mxu2 %v480_v0  ;;  %665 = vmatmul.bf16.vlgmr.msra.gmra.mxu3 %v481_v47  ;;  %v706_v1 = vpack.c.b16 %v704_v51, %v704_v51  ;;  %v707_v24 = vpack.c.b16 %v705_v49, %v705_v49 }
 0x268   :  { %678 = vmatmul.bf16.vlgmr.msrb.gmra.mxu1 %v480_v0  ;;  %691 = vmatmul.bf16.vlgmr.msrb.gmra.mxu0 %v481_v47 }
 0x277   :  { %878 = vmatmul.bf16.vlgmr.msrb.gmra.mxu2 %v706_v1  ;;  %891 = vmatmul.bf16.vlgmr.msrb.gmra.mxu3 %v707_v24 }
 0x278   :  { %904 = vmatmul.bf16.vlgmr.msra.gmra.mxu1 %v706_v1  ;;  %917 = vmatmul.bf16.vlgmr.msra.gmra.mxu0 %v707_v24 }
 0x2e5   :  { %v679_v26 = vpop.f32.mrf.mxu1  ;;  %v692_v30 = vpop.f32.mrf.mxu0 }
 0x2e6   :  { %v693_v13 = vadd.f32 %v692_v30, %v679_v26 }
 0x2ea   :  { %v653_v31 = vpop.f32.mrf.mxu2  ;;  %v666_v32 = vpop.f32.mrf.mxu3 }
 0x2eb   :  { %v667_v21 = vadd.f32 %v666_v32, %v653_v31 }
 0x2ed   :  { %v681_v33 = vpop.f32.mrf.mxu1  ;;  %v694_v62 = vpop.f32.mrf.mxu0 }
 0x2f2   :  { %v655_v38 = vpop.f32.mrf.mxu2  ;;  %v668_v36 = vpop.f32.mrf.mxu3 }
 0x2f5   :  { %v905_v41 = vpop.f32.mrf.mxu1  ;;  %v918_v42 = vpop.f32.mrf.mxu0 }
 0x2f6   :  { %v906_v18 = vadd.f32 %v905_v41, %v693_v13 }
 0x2f8   :  { %v919_v44 = vadd.f32 %v918_v42, %v906_v18 }
 0x2fa   :  { %v925_v45 = vadd.f32 %v923_v19, %v919_v44  ;;  %v879_v48 = vpop.f32.mrf.mxu2  ;;  %v892_v46 = vpop.f32.mrf.mxu3 }
 0x2fb   :  { %v880_v50 = vadd.f32 %v879_v48, %v667_v21 }
 0x2fc   :  { %v1292_v52 = vmul.f32 -1.442695, %v925_v45 }
 0x2fd   :  { %v893_v37 = vadd.f32 %v892_v46, %v880_v50  ;;  %v907_v20 = vpop.f32.mrf.mxu1  ;;  %v920_v53 = vpop.f32.mrf.mxu0 }
 0x2fe   :  { %1386 = vpow2.f32 %v1292_v52 }
 0x2ff   :  { %v924_v54 = vadd.f32 %v923_v19, %v893_v37 }
 0x301   :  { %v1291_v14 = vmul.f32 -1.442695, %v924_v54 }
 0x302   :  { %v881_v2 = vpop.f32.mrf.mxu2  ;;  %v894_v58 = vpop.f32.mrf.mxu3 }
 0x303   :  { %1388 = vpow2.f32 %v1291_v14 }
 0x304   :  { %v1387_v25 = vpop.eup %1386 }
 0x305   :  { %v933_v59 = vadd.f32 1.0, %v1387_v25 }
 0x307   :  { %1390 = vrcp.f32 %v933_v59  ;;  %v960_v7 = vand.u32 2147483648, %v933_v59  ;;  %v958_v8 = vand.u32 2147483647, %v933_v59  ;;  %vm954_vm14 = vweird.f32 %v933_v59 }
 0x309   :  { %v1389_v0 = vpop.eup %1388  ;;  %v961_v23 = vor.u32 1.1754944e-38, %v960_v7  ;;  %vm959_vm0 = vcmp.eq.f32.partialorder %v958_v8, 8.507059e+37 }
 0x30a   :  { %v932_v47 = vadd.f32 1.0, %v1389_v0 }
 0x30c   :  { %1392 = vrcp.f32 %v932_v47  ;;  %v945_v10 = vand.u32 2147483648, %v932_v47  ;;  %v943_v49 = vand.u32 2147483647, %v932_v47  ;;  %vm939_vm2 = vweird.f32 %v932_v47 }
 0x30d   :  { %v1391_v5 = vpop.eup %1390 }
 0x30e   :  { %v950_v60 = vmul.f32 %v1391_v5, %v933_v59  ;;  %vm955_vm13 = vweird.f32 %v1391_v5  ;;  %v946_v26 = vor.u32 1.1754944e-38, %v945_v10  ;;  %vm944_vm6 = vcmp.eq.f32.partialorder %v943_v49, 8.507059e+37 }
 0x30f   :  { %vm956_vm15 = vmor %vm954_vm14, %vm955_vm13 }
 0x310   :  { %v951_v6 = vsub.f32 1.0, %v950_v60 }
 0x312   :  { %v1393_v61 = vpop.eup %1392  ;;  %v952_v3 = vmul.f32 %v1391_v5, %v951_v6 }
 0x313   :  { %v935_v15 = vmul.f32 %v1393_v61, %v932_v47  ;;  %vm940_vm1 = vweird.f32 %v1393_v61 }
 0x314   :  { %v953_v16 = vadd.f32 %v1391_v5, %v952_v3  ;;  %vm941_vm3 = vmor %vm939_vm2, %vm940_vm1 }
 0x315   :  { %v936_v17 = vsub.f32 1.0, %v935_v15 }
 0x316   :  { %v957_v22 = vsel %vm956_vm15, %v1391_v5, %v953_v16 }
 0x317   :  { %v937_v51 = vmul.f32 %v1393_v61, %v936_v17  ;;  %v962_v1 = vsel %vm959_vm0, %v961_v23, %v957_v22 }
 0x318   :  { %v966_v30 = vrot.slane %v962_v1, 7 }
 0x319   :  { %v938_v24 = vadd.f32 %v1393_v61, %v937_v51 }
 0x31b   :  { %v942_v31 = vsel %vm941_vm3, %v1393_v61, %v938_v24 }
 0x31c   :  { %v947_v32 = vsel %vm944_vm6, %v946_v26, %v942_v31 }
 0x31d   :  { %v968_v33 = vsel %vm967_vm5, %v947_v32, %v966_v30  ;;  %v969_v62 = vsel %vm171_vm4, %v947_v32, %v966_v30 }
 0x31e   :  { %v970_v38 = vrot.slane %v969_v62, 1  ;;  %v971_v36 = vperm.slane %v968_v33, 0  ;;  %v972_v13 = vperm.slane %v968_v33, 1 }
 0x320   :  { %v979_v41 = vmul.f32 %v971_v36, %v1647_v11  ;;  %v980_v42 = vmul.f32 %v972_v13, %v1651_v12  ;;  %v981_v18 = vmul.f32 %v971_v36, %v1638_v39  ;;  %v982_v19 = vmul.f32 %v972_v13, %v1641_v40 }
 0x321   :  { %v973_v44 = vperm.slane %v970_v38, 0  ;;  %v983_v21 = vmul.f32 %v971_v36, %v1657_v56  ;;  %v974_v45 = vperm.slane %v970_v38, 1  ;;  %v984_v48 = vmul.f32 %v972_v13, %v1660_v57 }
 0x322   :  { %995 = vst [vmem:[#allocation9] sm:$0xff] %v979_v41  ;;  %v985_v46 = vmul.f32 %v971_v36, %v1694_v34  ;;  %v986_v50 = vmul.f32 %v972_v13, %v1697_v35 }
 0x323   :  { %996 = vst [vmem:[#allocation9 + $0x8] sm:$0xff] %v980_v42  ;;  %v987_v11 = vmul.f32 %v973_v44, %v1654_v55  ;;  %v988_v39 = vmul.f32 %v974_v45, %v1680_v63  ;;  %v989_v40 = vmul.f32 %v973_v44, %v1664_v4  ;;  %v990_v12 = vmul.f32 %v974_v45, %v1677_v9 }
 0x324   :  { %997 = vst [vmem:[#allocation9 + $0x10] sm:$0xff] %v981_v18  ;;  %v991_v56 = vmul.f32 %v973_v44, %v1691_v27  ;;  %v992_v57 = vmul.f32 %v974_v45, %v1704_v43  ;;  %v993_v34 = vmul.f32 %v973_v44, %v1717_v28  ;;  %v994_v55 = vmul.f32 %v974_v45, %v1720_v29 }
 0x325   :  { %998 = vst [vmem:[#allocation9 + $0x18] sm:$0xff] %v982_v19 }
 0x326   :  { %999 = vst [vmem:[#allocation9 + $0x20] sm:$0xff] %v983_v21 }
 0x327   :  { %1000 = vst [vmem:[#allocation9 + $0x28] sm:$0xff] %v984_v48 }
 0x328   :  { %1001 = vst [vmem:[#allocation9 + $0x30] sm:$0xff] %v985_v46 }
 0x329   :  { %1002 = vst [vmem:[#allocation9 + $0x38] sm:$0xff] %v986_v50 }
 0x32a   :  { %1003 = vst [vmem:[#allocation9 + $0x40] sm:$0xff] %v987_v11 }
 0x32b   :  { %1004 = vst [vmem:[#allocation9 + $0x48] sm:$0xff] %v988_v39 }
 0x32c   :  { %1005 = vst [vmem:[#allocation9 + $0x50] sm:$0xff] %v989_v40 }
 0x32d   :  { %1006 = vst [vmem:[#allocation9 + $0x58] sm:$0xff] %v990_v12 }
 0x32e   :  { %1007 = vst [vmem:[#allocation9 + $0x60] sm:$0xff] %v991_v56 }
 0x32f   :  { %1008 = vst [vmem:[#allocation9 + $0x68] sm:$0xff] %v992_v57 }
 0x330   :  { %1009 = vst [vmem:[#allocation9 + $0x70] sm:$0xff] %v993_v34 }
 0x331   :  { %1010 = vst [vmem:[#allocation9 + $0x78] sm:$0xff] %v994_v55 }
 0x332   :  { %1023 = dma.vmem_to_hbm [thread:$0]  %s1016_s6, 2048, %s1018_s14, [#allocation5], %s1501_s21, %s1501_s21, %s1502_s22  }
 0x333   :  { %1494 = dma.done.wait [#allocation5], 2048  }
 0x334   :  { %1495 = vsyncadd [#allocation5], 4294965248 }
 0x335   :  { %1028 = vsyncpa [#allocation4], 1 }
 0x336   :  { %1029 = vsyncpa [#allocation7], 1 }
 0x337   :  { %1030 = vsyncpa [#allocation5], 1 }

// kernel: tpu_custom_call.1
= control target key start
LH: loop header
LB: loop body
LE: loop exit
PB: predicated region body
PF: predicated region fallthrough
CT: control target
= control target key end

     0   :  { %14 = vsyncpa [#allocation4], 0  ;;  %s1761_s0 = inlined_call_operand.vmem [shape: f32[32,2], index: 0, kind: input, shape index: {}]   ;;  %s1762_s1 = inlined_call_operand.vmem [shape: f32[1,2], index: 1, kind: input, shape index: {}]   ;;  %s1763_s2 = inlined_call_operand.vmem [shape: f32[2,32], index: 2, kind: input, shape index: {}]   ;;  %s1764_s3 = inlined_call_operand.vmem [shape: f32[1,32], index: 3, kind: input, shape index: {}]   ;;  %s1765_s4 = inlined_call_operand.hbm [shape: bf16[256,256], index: 4, kind: input, shape index: {}]   ;;  %s1766_s5 = inlined_call_operand.hbm [shape: bf16[256,256], index: 5, kind: input, shape index: {}]   ;;  %s1767_s6 = inlined_call_operand.<no memory space> [shape: f32[1], index: 6, kind: input, shape index: {}]   ;;  %s1768_s7 = inlined_call_operand.hbm [shape: f32[2,32,256], index: 7, kind: input, shape index: {}]   ;;  %s1769_s8 = inlined_call_operand.hbm [shape: f32[2,32,256], index: 8, kind: output, shape index: {}]  }
   0x1   :  { %15 = vsyncpa [#allocation7], 0 }
   0x2   :  { %16 = vsyncpa [#allocation5], 0  ;;  %s42_s29 = sshll.u32 %s1766_s5, 4  ;;  %s1496_s30 = smov [#allocation6]   ;;  %s43_s29 = int_to_ptr.hbm [resolvable:$true] %s42_s29 }
   0x3   :  { %s44_s9 = sshll.u32 %s1496_s30, 4  ;;  %s29_s12 = sshll.u32 %s1765_s4, 4  ;;  %s45_s9 = int_to_ptr.vmem [resolvable:$true] %s44_s9  ;;  %s30_s12 = int_to_ptr.hbm [resolvable:$true] %s29_s12 }
   0x4   :  { %s1497_s13 = smov 128   ;;  %s1498_s14 = smov 8  }
   0x5   :  { %50 = dma.hbm_to_vmem [thread:$0]  %s43_s29, 4096, %s45_s9, [#allocation7], %s1497_s13, %s1497_s13, %s1498_s14  }
   0x6   :  { %s1499_s15 = smov [#allocation3]   ;;  %s57_s19 = sshll.u32 %s1768_s7, 4  ;;  %s58_s19 = int_to_ptr.hbm [resolvable:$true] %s57_s19 }
   0x7   :  { %s31_s16 = sshll.u32 %s1499_s15, 4  ;;  %s1500_s5 = smov [#allocation8]   ;;  %s32_s16 = int_to_ptr.vmem [resolvable:$true] %s31_s16 }
   0x8   :  { %37 = dma.hbm_to_vmem [thread:$0]  %s30_s12, 4096, %s32_s16, [#allocation4], %s1497_s13, %s1497_s13, %s1498_s14  }
   0x9   :  { %s59_s20 = sshll.u32 %s1500_s5, 4  ;;  %s1501_s21 = smov 256   ;;  %s60_s20 = int_to_ptr.vmem [resolvable:$true] %s59_s20 }
   0xa   :  { %s1502_s22 = smov 16  }
   0xb   :  { %65 = dma.hbm_to_vmem [thread:$0]  %s58_s19, 2048, %s60_s20, [#allocation7], %s1501_s21, %s1501_s21, %s1502_s22  }
   0xc   :  { %1490 = dma.done.wait [#allocation4], 4096  }
   0xd   :  { %1491 = vsyncadd [#allocation4], 4294963200 }
   0xe   :  { %1492 = dma.done.wait [#allocation7], 6144  }
   0xf   :  { %1493 = vsyncadd [#allocation7], 4294961152  ;;  %v1563_v0 = vld [vmem:[#allocation8 + $0x40] sm:$0xff]  ;;  %v1565_v1 = vld [vmem:[#allocation8 + $0x48] sm:$0xff]  ;;  %v1503_v25 = vmov 256.0   ;;  %v149_v36 = vlaneseq  ;;  %vm154_vm1 = vcmask 130112  }
  0x10   :  { %v1567_v2 = vld [vmem:[#allocation8] sm:$0xff]  ;;  %v106_v3 = vadd.f32 %v1565_v1, %v1563_v0  ;;  %v1571_v4 = vld [vmem:[#allocation8 + $0x8] sm:$0xff]  ;;  %v1581_v9 = vld [vmem:[#allocation8 + $0x50] sm:$0xff]  ;;  %1378 = vrcp.f32 %v1503_v25  ;;  %vm158_vm2 = vcmask 195712   ;;  %vm162_vm3 = vcmask 261312   ;;  %s1017_s14 = sshll.u32 %s1769_s8, 4  ;;  %s1018_s14 = int_to_ptr.hbm [resolvable:$true] %s1017_s14 }
  0x11   :  { %v1573_v5 = vld [vmem:[#allocation8 + $0x20] sm:$0xff]  ;;  %v1575_v6 = vld [vmem:[#allocation8 + $0x28] sm:$0xff]  ;;  %v94_v7 = vadd.f32 %v1571_v4, %v1567_v2  ;;  %v1583_v10 = vld [vmem:[#allocation8 + $0x58] sm:$0xff]  ;;  %v150_v38 = vand.u32 127, %v149_v36  ;;  %vm171_vm4 = vcmask 1041409   ;;  %vm173_vm5 = vcmask 261120  }
  0x12   :  { %v100_v8 = vadd.f32 %v1575_v6, %v1573_v5  ;;  %107 = vadd.xlane.f32.xlu1 %v106_v3  ;;  %v1585_v11 = vld [vmem:[#allocation8 + $0x10] sm:$0xff]  ;;  %v1587_v12 = vld [vmem:[#allocation8 + $0x18] sm:$0xff]  ;;  %v1589_v13 = vld [vmem:[#allocation8 + $0x60] sm:$0xff]  ;;  %v109_v15 = vadd.f32 %v1583_v10, %v1581_v9  ;;  %vm206_vm6 = vcmask 1041408   ;;  %vm202_vm7 = vcmask 15360  }
  0x13   :  { %95 = vadd.xlane.f32.xlu0 %v94_v7  ;;  %v1591_v14 = vld [vmem:[#allocation8 + $0x68] sm:$0xff]  ;;  %v97_v16 = vadd.f32 %v1587_v12, %v1585_v11  ;;  %v1599_v18 = vld [vmem:[#allocation8 + $0x70] sm:$0xff]  ;;  %v1601_v19 = vld [vmem:[#allocation8 + $0x78] sm:$0xff]  ;;  %v152_v41 = vadd.s32 4294967288, %v150_v38  ;;  %v156_v50 = vadd.s32 4294967280, %v150_v38  ;;  %v160_v54 = vadd.s32 4294967272, %v150_v38 }
  0x14   :  { %101 = vadd.xlane.f32.xlu2 %v100_v8  ;;  %v112_v17 = vadd.f32 %v1591_v14, %v1589_v13  ;;  %v1603_v20 = vld [vmem:[#allocation8 + $0x30] sm:$0xff]  ;;  %v1605_v21 = vld [vmem:[#allocation8 + $0x38] sm:$0xff]  ;;  %v115_v22 = vadd.f32 %v1601_v19, %v1599_v18  ;;  %v134_v27 = vld [vmem:[%s1761_s0 + $0x8] sm:$0xff] }
  0x15   :  { %v103_v23 = vadd.f32 %v1605_v21, %v1603_v20  ;;  %v136_v24 = vld [vmem:[%s1761_s0 + $0x18] sm:$0xff]  ;;  %v135_v26 = vld [vmem:[%s1761_s0 + $0x10] sm:$0xff]  ;;  %v133_v28 = vld [vmem:[%s1761_s0] sm:$0xff] }
  0x16   :  { %188 = vmatpush.msra.mxu0 %v136_v24  ;;  %v1379_v29 = vpop.eup %1378  ;;  %v1376_v24 = vld [vmem:[%s1762_s1] ss:$0 sm:$0xff] }
  0x17   :  { %v119_v30 = vmul.f32 256.0, %v1379_v29  ;;  %vm123_vm0 = vweird.f32 %v1379_v29 }
  0x18   :  { %189 = vmatpush.msra.mxu0 %v135_v26 }
  0x19   :  { %v120_v31 = vsub.f32 1.0, %v119_v30  ;;  %v1377_v30 = vld [vmem:[%s1764_s3] ss:$0 sm:$0xff]  ;;  %s1505_s3 = smov [#allocation9]  }
  0x1a   :  { %110 = vadd.xlane.f32.xlu1 %v109_v15  ;;  %190 = vmatpush.msra.mxu0 %v134_v27 }
  0x1b   :  { %98 = vadd.xlane.f32.xlu0 %v97_v16  ;;  %v121_v32 = vmul.f32 %v1379_v29, %v120_v31 }
  0x1c   :  { %113 = vadd.xlane.f32.xlu2 %v112_v17  ;;  %191 = vmatpush.msra.mxu0 %v133_v28  ;;  %v251_v28 = vshrl.u32 %v149_v36, 7 }
  0x1d   :  { %v122_v37 = vadd.f32 %v1379_v29, %v121_v32 }
  0x1e   :  { %1369 = vset.pattern.permute.xlu1 %v251_v28  ;;  %1367 = vset.pattern.permute.xlu2 %v251_v28 }
  0x1f   :  { %v124_v39 = vsel %vm123_vm0, %v1379_v29, %v122_v37  ;;  %v258_v29 = vadd.s32 8, %v251_v28 }
  0x21   :  { %1368 = vset.pattern.permute.xlu0 %v258_v29 }
  0x22   :  { %116 = vadd.xlane.f32.xlu1 %v115_v22 }
  0x23   :  { %104 = vadd.xlane.f32.xlu0 %v103_v23  ;;  %v197_v23 = vld [vmem:[%s1763_s2] sm:$0x3] }
  0x24   :  { %1032 = vmatpush.msk.msra.mxu1 %vm206_vm6, %v197_v23 }
  0x85   :  { %v108_v33 = vpop.xlane.xlu1 %107 }
  0x86   :  { %v96_v34 = vpop.xlane.xlu0 %95  ;;  %v129_v46 = vmul.f32 %v124_v39, %v108_v33 }
  0x87   :  { %v102_v35 = vpop.xlane.xlu2 %101  ;;  %v125_v47 = vmul.f32 %v124_v39, %v96_v34 }
  0x88   :  { %v164_v52 = vperm.slane %v129_v46, %v150_v38  ;;  %v127_v53 = vmul.f32 %v124_v39, %v102_v35 }
  0x89   :  { %v151_v55 = vperm.slane %v125_v47, %v150_v38 }
  0x8a   :  { %v157_v63 = vperm.slane %v127_v53, %v156_v50 }
  0x8d   :  { %v111_v40 = vpop.xlane.xlu1 %110 }
  0x8e   :  { %v130_v42 = vmul.f32 %v124_v39, %v111_v40  ;;  %v99_v43 = vpop.xlane.xlu0 %98 }
  0x8f   :  { %v114_v44 = vpop.xlane.xlu2 %113  ;;  %v126_v45 = vmul.f32 %v124_v39, %v99_v43 }
  0x90   :  { %v131_v48 = vmul.f32 %v124_v39, %v114_v44  ;;  %v165_v49 = vperm.slane %v130_v42, %v152_v41 }
  0x91   :  { %v153_v51 = vperm.slane %v126_v45, %v152_v41 }
  0x92   :  { %v167_v56 = vperm.slane %v131_v48, %v156_v50  ;;  %v166_v58 = vsel %vm154_vm1, %v165_v49, %v164_v52  ;;  %v264_v48 = vadd.s32 16, %v251_v28  ;;  %v270_v49 = vadd.s32 24, %v251_v28  ;;  %v1093_v50 = vld [vmem:[#allocation6 + $0x70] sm:$0xf] }
  0x93   :  { %v155_v61 = vsel %vm154_vm1, %v153_v51, %v151_v55  ;;  %v1340_v51 = vld [vmem:[#allocation6 + $0x74] sm:$0xf0]  ;;  %v1157_v52 = vld [vmem:[#allocation6 + $0xf0] sm:$0xf]  ;;  %v1339_v55 = vld [vmem:[#allocation6 + $0x74] sm:$0xf] }
  0x94   :  { %v168_v8 = vsel %vm158_vm2, %v167_v56, %v166_v58  ;;  %v159_v15 = vsel %vm158_vm2, %v157_v63, %v155_v61  ;;  %v1094_v53 = vor.u32 %v1340_v51, %v1093_v50  ;;  %v1095_v56 = vld [vmem:[#allocation6 + $0x78] sm:$0xf0]  ;;  %v1085_v61 = vld [vmem:[#allocation6 + $0x60] sm:$0xf]  ;;  %v1338_v63 = vld [vmem:[#allocation6 + $0x64] sm:$0xf0] }
  0x95   :  { %v117_v57 = vpop.xlane.xlu1 %116  ;;  %v1098_v58 = vor.u32 %v1339_v55, %v1095_v56  ;;  %v1141_v28 = vld [vmem:[#allocation6 + $0xd0] sm:$0xf]  ;;  %v1332_v51 = vld [vmem:[#allocation6 + $0x34] sm:$0xf0]  ;;  %v1331_v55 = vld [vmem:[#allocation6 + $0x34] sm:$0xf] }
  0x96   :  { %v132_v59 = vmul.f32 %v124_v39, %v117_v57  ;;  %v105_v60 = vpop.xlane.xlu0 %104  ;;  %644 = vmatpush.bf16.msra.mxu2 %v1094_v53  ;;  %v1061_v50 = vld [vmem:[#allocation6 + $0x30] sm:$0xf]  ;;  %v1063_v56 = vld [vmem:[#allocation6 + $0x38] sm:$0xf0] }
  0x97   :  { %v128_v62 = vmul.f32 %v124_v39, %v105_v60  ;;  %v1159_v60 = vld [vmem:[#allocation6 + $0xf8] sm:$0xf0]  ;;  %670 = vmatpush.bf16.msrb.mxu1 %v1098_v58  ;;  %v1062_v53 = vor.u32 %v1332_v51, %v1061_v50  ;;  %v1066_v58 = vor.u32 %v1331_v55, %v1063_v56  ;;  %v1221_v50 = vld [vmem:[#allocation3 + $0x70] sm:$0xf]  ;;  %v1324_v55 = vld [vmem:[#allocation3 + $0xf4] sm:$0xf0] }
  0x98   :  { %v169_v3 = vperm.slane %v132_v59, %v160_v54  ;;  %v1355_v59 = vld [vmem:[#allocation6 + $0xf4] sm:$0xf] }
  0x99   :  { %v161_v7 = vperm.slane %v128_v62, %v160_v54  ;;  %v1356_v54 = vld [vmem:[#allocation6 + $0xf4] sm:$0xf0]  ;;  %v1162_v62 = vor.u32 %v1355_v59, %v1159_v60  ;;  %v1347_v59 = vld [vmem:[#allocation6 + $0xb4] sm:$0xf]  ;;  %v1127_v60 = vld [vmem:[#allocation6 + $0xb8] sm:$0xf0] }
  0x9a   :  { %v170_v16 = vsel %vm162_vm3, %v169_v3, %v168_v8  ;;  %v1158_v57 = vor.u32 %v1356_v54, %v1157_v52  ;;  %v1149_v3 = vld [vmem:[#allocation6 + $0xe0] sm:$0xf]  ;;  %v1086_v8 = vor.u32 %v1338_v63, %v1085_v61  ;;  %v1125_v52 = vld [vmem:[#allocation6 + $0xb0] sm:$0xf]  ;;  %v1348_v54 = vld [vmem:[#allocation6 + $0xb4] sm:$0xf0]  ;;  %v1130_v61 = vor.u32 %v1347_v59, %v1127_v60 }
  0x9b   :  { %v163_v17 = vsel %vm162_vm3, %v161_v7, %v159_v15  ;;  %v1354_v7 = vld [vmem:[#allocation6 + $0xe4] sm:$0xf0]  ;;  %683 = vmatpush.bf16.msrb.mxu0 %v1162_v62  ;;  %v1053_v62 = vld [vmem:[#allocation6 + $0x20] sm:$0xf]  ;;  %v1223_v59 = vld [vmem:[#allocation3 + $0x78] sm:$0xf0] }
  0x9c   :  { %v172_v22 = vsel %vm171_vm4, %v170_v16, %v163_v17  ;;  %657 = vmatpush.bf16.msra.mxu3 %v1158_v57  ;;  %v1150_v15 = vor.u32 %v1354_v7, %v1149_v3  ;;  %v1337_v16 = vld [vmem:[#allocation6 + $0x64] sm:$0xf]  ;;  %v1087_v17 = vld [vmem:[#allocation6 + $0x68] sm:$0xf0]  ;;  %645 = vmatpush.bf16.msra.mxu2 %v1086_v8  ;;  %v1126_v57 = vor.u32 %v1348_v54, %v1125_v52  ;;  %v1330_v63 = vld [vmem:[#allocation6 + $0x24] sm:$0xf0] }
  0x9d   :  { %1031 = vmatmul.msk.f32.vlgmr.msra.gmra.mxu0 %vm173_vm5, %v172_v22  ;;  %v1353_v22 = vld [vmem:[#allocation6 + $0xe4] sm:$0xf]  ;;  %v1090_v23 = vor.u32 %v1337_v16, %v1087_v17  ;;  %v1117_v3 = vld [vmem:[#allocation6 + $0xa0] sm:$0xf]  ;;  %v1054_v7 = vor.u32 %v1330_v63, %v1053_v62  ;;  %v1346_v8 = vld [vmem:[#allocation6 + $0xa4] sm:$0xf0] }
  0x9e   :  { %v1055_v16 = vld [vmem:[#allocation6 + $0x28] sm:$0xf0]  ;;  %v1118_v17 = vor.u32 %v1346_v8, %v1117_v3  ;;  %v1285_v54 = vld [vmem:[#allocation3 + $0xf0] sm:$0xf]  ;;  %v1323_v60 = vld [vmem:[#allocation3 + $0xf4] sm:$0xf] }
  0x9f   :  { %671 = vmatpush.bf16.msrb.mxu1 %v1090_v23  ;;  %v1345_v23 = vld [vmem:[#allocation6 + $0xa4] sm:$0xf]  ;;  %v1287_v62 = vld [vmem:[#allocation3 + $0xf8] sm:$0xf0]  ;;  %v1213_v63 = vld [vmem:[#allocation3 + $0x60] sm:$0xf] }
  0xa0   :  { %658 = vmatpush.bf16.msra.mxu3 %v1150_v15  ;;  %v1329_v15 = vld [vmem:[#allocation6 + $0x24] sm:$0xf]  ;;  %v1306_v3 = vld [vmem:[#allocation3 + $0x64] sm:$0xf0]  ;;  %vm967_vm5 = vcmask 1040384  }
  0xa1   :  { %v1322_v8 = vld [vmem:[#allocation3 + $0xe4] sm:$0xf0] }
 0x11a   :  { %v193_v25 = vpop.f32.mrf.mxu0 }
 0x11b   :  { %v194_v26 = vadd.f32 %v1376_v24, %v193_v25  ;;  %v1151_v24 = vld [vmem:[#allocation6 + $0xe8] sm:$0xf0] }
 0x11c   :  { %v1154_v25 = vor.u32 %v1353_v22, %v1151_v24  ;;  %v1058_v22 = vor.u32 %v1329_v15, %v1055_v16  ;;  %v1119_v24 = vld [vmem:[#allocation6 + $0xa8] sm:$0xf0]  ;;  %v1305_v15 = vld [vmem:[#allocation3 + $0x64] sm:$0xf]  ;;  %v1290_v16 = vor.u32 %v1323_v60, %v1287_v62 }
 0x11d   :  { %v196_v27 = vmax.f32 %v194_v26, 0.0  ;;  %v1077_v26 = vld [vmem:[#allocation6 + $0x50] sm:$0xf] }
 0x11e   :  { %684 = vmatpush.bf16.msrb.mxu0 %v1154_v25 }
 0x11f   :  { %1033 = vmatmul.msk.f32.vlgmr.msra.gmra.mxu1 %vm202_vm7, %v196_v27  ;;  %v1336_v27 = vld [vmem:[#allocation6 + $0x54] sm:$0xf0] }
 0x19c   :  { %v227_v31 = vpop.f32.mrf.mxu1 }
 0x19d   :  { %v228_v32 = vadd.f32 %v1377_v30, %v227_v31  ;;  %v1352_v30 = vld [vmem:[#allocation6 + $0xd4] sm:$0xf0]  ;;  %v1335_v31 = vld [vmem:[#allocation6 + $0x54] sm:$0xf] }
 0x19f   :  { %v1034_v33 = vmul.f32 -1.442695, %v228_v32  ;;  %v1079_v32 = vld [vmem:[#allocation6 + $0x58] sm:$0xf0] }
 0x1a1   :  { %1380 = vpow2.f32 %v1034_v33  ;;  %v1142_v33 = vor.u32 %v1352_v30, %v1141_v28  ;;  %v1328_v28 = vld [vmem:[#allocation6 + $0x14] sm:$0xf0] }
 0x1a2   :  { %v1344_v30 = vld [vmem:[#allocation6 + $0x94] sm:$0xf0] }
 0x1a3   :  { %659 = vmatpush.bf16.msra.mxu3 %v1142_v33  ;;  %v1343_v33 = vld [vmem:[#allocation6 + $0x94] sm:$0xf] }
 0x1a7   :  { %v1381_v34 = vpop.eup %1380 }
 0x1a8   :  { %v233_v35 = vadd.f32 1.0, %v1381_v34  ;;  %v1082_v34 = vor.u32 %v1335_v31, %v1079_v32  ;;  %v1327_v31 = vld [vmem:[#allocation6 + $0x14] sm:$0xf]  ;;  %v1047_v32 = vld [vmem:[#allocation6 + $0x18] sm:$0xf0] }
 0x1aa   :  { %1382 = vrcp.f32 %v233_v35  ;;  %v245_v40 = vand.u32 2147483648, %v233_v35  ;;  %v243_v41 = vand.u32 2147483647, %v233_v35  ;;  %vm239_vm9 = vweird.f32 %v233_v35  ;;  %672 = vmatpush.bf16.msrb.mxu1 %v1082_v34  ;;  %v1111_v34 = vld [vmem:[#allocation6 + $0x98] sm:$0xf0] }
 0x1ac   :  { %v246_v43 = vor.u32 1.1754944e-38, %v245_v40  ;;  %vm244_vm11 = vcmp.eq.f32.partialorder %v243_v41, 8.507059e+37  ;;  %v1334_v40 = vld [vmem:[#allocation6 + $0x44] sm:$0xf0] }
 0x1ad   :  { %v1350_v41 = vld [vmem:[#allocation6 + $0xc4] sm:$0xf0] }
 0x1b0   :  { %v1383_v37 = vpop.eup %1382 }
 0x1b1   :  { %v235_v38 = vmul.f32 %v1383_v37, %v233_v35  ;;  %vm240_vm8 = vweird.f32 %v1383_v37  ;;  %v1351_v35 = vld [vmem:[#allocation6 + $0xd4] sm:$0xf] }
 0x1b2   :  { %vm241_vm10 = vmor %vm239_vm9, %vm240_vm8 }
 0x1b3   :  { %v236_v39 = vsub.f32 1.0, %v235_v38  ;;  %v1069_v38 = vld [vmem:[#allocation6 + $0x40] sm:$0xf] }
 0x1b5   :  { %v237_v36 = vmul.f32 %v1383_v37, %v236_v39 }
 0x1b7   :  { %v238_v42 = vadd.f32 %v1383_v37, %v237_v36  ;;  %v1133_v36 = vld [vmem:[#allocation6 + $0xc0] sm:$0xf] }
 0x1b9   :  { %v242_v44 = vsel %vm241_vm10, %v1383_v37, %v238_v42  ;;  %v1143_v37 = vld [vmem:[#allocation6 + $0xd8] sm:$0xf0]  ;;  %v1070_v42 = vor.u32 %v1334_v40, %v1069_v38  ;;  %v1050_v38 = vor.u32 %v1327_v31, %v1047_v32  ;;  %v1037_v40 = vld [vmem:[#allocation6] sm:$0xf]  ;;  %v1205_v32 = vld [vmem:[#allocation3 + $0x50] sm:$0xf] }
 0x1ba   :  { %v247_v45 = vsel %vm244_vm11, %v246_v43, %v242_v44  ;;  %v1146_v39 = vor.u32 %v1351_v35, %v1143_v37  ;;  %v1134_v43 = vor.u32 %v1350_v41, %v1133_v36  ;;  %v1333_v44 = vld [vmem:[#allocation6 + $0x44] sm:$0xf]  ;;  %v1326_v36 = vld [vmem:[#allocation6 + $0x4] sm:$0xf0]  ;;  %v1101_v41 = vld [vmem:[#allocation6 + $0x80] sm:$0xf] }
 0x1bb   :  { %v274_v46 = vperm.slane %v247_v45, 1  ;;  %v249_v47 = vperm.slane %v247_v45, 0  ;;  %v1071_v45 = vld [vmem:[#allocation6 + $0x48] sm:$0xf0] }
 0x1bc   :  { %685 = vmatpush.bf16.msrb.mxu0 %v1146_v39  ;;  %660 = vmatpush.bf16.msra.mxu3 %v1134_v43  ;;  %v1114_v39 = vor.u32 %v1343_v33, %v1111_v34  ;;  %v1342_v43 = vld [vmem:[#allocation6 + $0x84] sm:$0xf0]  ;;  %v1304_v33 = vld [vmem:[#allocation3 + $0x54] sm:$0xf0]  ;;  %v1269_v34 = vld [vmem:[#allocation3 + $0xd0] sm:$0xf] }
 0x1bd   :  { %279 = vperm.xlu1 %1369, %v274_v46   ;;  %260 = vperm.xlu0 %1368, %v249_v47  }
 0x1be   :  { %254 = vperm.xlu2 %1367, %v249_v47  }
 0x1c0   :  { %661 = vmatpush.bf16.msra.mxu3 %v1126_v57  ;;  %v1286_v57 = vor.u32 %v1324_v55, %v1285_v54  ;;  %v1199_v54 = vld [vmem:[#allocation3 + $0x48] sm:$0xf0] }
 0x1c4   :  { %662 = vmatpush.bf16.msra.mxu3 %v1118_v17  ;;  %v1214_v17 = vor.u32 %v1306_v3, %v1213_v63 }
 0x1c5   :  { %1372 = vset.pattern.permute.xlu1 %v264_v48  ;;  %1375 = vset.pattern.permute.xlu0 %v270_v49 }
 0x1c6   :  { %1370 = vset.pattern.permute.xlu2 %v258_v29  ;;  %v1078_v29 = vor.u32 %v1336_v27, %v1077_v26  ;;  %v1122_v26 = vor.u32 %v1345_v23, %v1119_v24  ;;  %v1045_v27 = vld [vmem:[#allocation6 + $0x10] sm:$0xf]  ;;  %v1321_v23 = vld [vmem:[#allocation3 + $0xe4] sm:$0xf]  ;;  %v1279_v24 = vld [vmem:[#allocation3 + $0xe8] sm:$0xf0] }
 0x1c7   :  { %v1046_v35 = vor.u32 %v1328_v28, %v1045_v27  ;;  %v1282_v31 = vor.u32 %v1321_v23, %v1279_v24  ;;  %v1191_v24 = vld [vmem:[#allocation3 + $0x38] sm:$0xf0] }
 0x1c8   :  { %646 = vmatpush.bf16.msra.mxu2 %v1078_v29  ;;  %v1109_v29 = vld [vmem:[#allocation6 + $0x90] sm:$0xf] }
 0x1c9   :  { %v1110_v37 = vor.u32 %v1344_v30, %v1109_v29 }
 0x1cb   :  { %663 = vmatpush.bf16.msra.mxu3 %v1110_v37  ;;  %v1303_v37 = vld [vmem:[#allocation3 + $0x54] sm:$0xf] }
 0x1cc   :  { %647 = vmatpush.bf16.msra.mxu2 %v1070_v42  ;;  %v1038_v42 = vor.u32 %v1326_v36, %v1037_v40 }
 0x1cd   :  { %291 = vperm.xlu1 %1372, %v274_v46  }
 0x1ce   :  { %285 = vperm.xlu2 %1370, %v274_v46  }
 0x1d0   :  { %648 = vmatpush.bf16.msra.mxu2 %v1062_v53  ;;  %v1308_v53 = vld [vmem:[#allocation3 + $0x74] sm:$0xf0] }
 0x1d1   :  { %v1222_v56 = vor.u32 %v1308_v53, %v1221_v50  ;;  %v1301_v53 = vld [vmem:[#allocation3 + $0x44] sm:$0xf] }
 0x1d4   :  { %649 = vmatpush.bf16.msra.mxu2 %v1054_v7  ;;  %v1277_v7 = vld [vmem:[#allocation3 + $0xe0] sm:$0xf] }
 0x1d5   :  { %1374 = vset.pattern.permute.xlu1 %v270_v49  ;;  %v1278_v29 = vor.u32 %v1322_v8, %v1277_v7  ;;  %v1189_v8 = vld [vmem:[#allocation3 + $0x30] sm:$0xf] }
 0x1d6   :  { %1371 = vset.pattern.permute.xlu2 %v264_v48  ;;  %v1135_v48 = vld [vmem:[#allocation6 + $0xc8] sm:$0xf0] }
 0x1d8   :  { %650 = vmatpush.bf16.msra.mxu2 %v1046_v35  ;;  %v1320_v35 = vld [vmem:[#allocation3 + $0xd4] sm:$0xf0] }
 0x1dc   :  { %651 = vmatpush.bf16.msra.mxu2 %v1038_v42  ;;  %v1319_v42 = vld [vmem:[#allocation3 + $0xd4] sm:$0xf] }
 0x1dd   :  { %297 = vperm.xlu1 %1374, %v274_v46   ;;  %v1349_v46 = vld [vmem:[#allocation6 + $0xc4] sm:$0xf] }
 0x1de   :  { %266 = vperm.xlu2 %1371, %v249_v47  }
 0x1e0   :  { %870 = vmatpush.bf16.msrb.mxu2 %v1222_v56 }
 0x1e4   :  { %871 = vmatpush.bf16.msrb.mxu2 %v1214_v17 }
 0x1e6   :  { %1373 = vset.pattern.permute.xlu2 %v270_v49  ;;  %v1138_v49 = vor.u32 %v1349_v46, %v1135_v48  ;;  %v1102_v46 = vor.u32 %v1342_v43, %v1101_v41  ;;  %v1341_v48 = vld [vmem:[#allocation6 + $0x84] sm:$0xf]  ;;  %v1206_v41 = vor.u32 %v1304_v33, %v1205_v32  ;;  %v1271_v43 = vld [vmem:[#allocation3 + $0xd8] sm:$0xf0]  ;;  %v1181_v33 = vld [vmem:[#allocation3 + $0x20] sm:$0xf] }
 0x1e7   :  { %v1274_v50 = vor.u32 %v1319_v42, %v1271_v43  ;;  %v1255_v32 = vld [vmem:[#allocation3 + $0xb8] sm:$0xf0] }
 0x1e8   :  { %686 = vmatpush.bf16.msrb.mxu0 %v1138_v49  ;;  %v1103_v49 = vld [vmem:[#allocation6 + $0x88] sm:$0xf0]  ;;  %664 = vmatpush.bf16.msra.mxu3 %v1102_v46  ;;  %v1197_v46 = vld [vmem:[#allocation3 + $0x40] sm:$0xf] }
 0x1e9   :  { %v1106_v52 = vor.u32 %v1341_v48, %v1103_v49  ;;  %v1261_v48 = vld [vmem:[#allocation3 + $0xc0] sm:$0xf]  ;;  %872 = vmatpush.bf16.msrb.mxu2 %v1206_v41 }
 0x1ec   :  { %687 = vmatpush.bf16.msrb.mxu0 %v1130_v61  ;;  %883 = vmatpush.bf16.msrb.mxu3 %v1286_v57 }
 0x1ee   :  { %272 = vperm.xlu2 %1373, %v249_v47   ;;  %v1074_v47 = vor.u32 %v1333_v44, %v1071_v45  ;;  %v1325_v44 = vld [vmem:[#allocation6 + $0x4] sm:$0xf]  ;;  %v1039_v45 = vld [vmem:[#allocation6 + $0x8] sm:$0xf0] }
 0x1f0   :  { %673 = vmatpush.bf16.msrb.mxu1 %v1074_v47  ;;  %688 = vmatpush.bf16.msrb.mxu0 %v1122_v26  ;;  %v1042_v47 = vor.u32 %v1325_v44, %v1039_v45  ;;  %v1504_v26 = vmov 32.0   ;;  %v1270_v44 = vor.u32 %v1320_v35, %v1269_v34 }
 0x1f1   :  { %1384 = vrcp.f32 %v1504_v26  ;;  %884 = vmatpush.bf16.msrb.mxu3 %v1278_v29 }
 0x1f4   :  { %674 = vmatpush.bf16.msrb.mxu1 %v1066_v58  ;;  %689 = vmatpush.bf16.msrb.mxu0 %v1114_v39  ;;  %v1307_v58 = vld [vmem:[#allocation3 + $0x74] sm:$0xf] }
 0x1f5   :  { %v1226_v61 = vor.u32 %v1307_v58, %v1223_v59  ;;  %v1263_v58 = vld [vmem:[#allocation3 + $0xc8] sm:$0xf0]  ;;  %885 = vmatpush.bf16.msrb.mxu3 %v1270_v44  ;;  %v1297_v44 = vld [vmem:[#allocation3 + $0x24] sm:$0xf] }
 0x1f7   :  { %v1643_v49 = vpop.eup %1384 }
 0x1f8   :  { %675 = vmatpush.bf16.msrb.mxu1 %v1058_v22  ;;  %690 = vmatpush.bf16.msrb.mxu0 %v1106_v52  ;;  %v1215_v22 = vld [vmem:[#allocation3 + $0x68] sm:$0xf0]  ;;  %v1318_v52 = vld [vmem:[#allocation3 + $0xc4] sm:$0xf0]  ;;  %v1673_v62 = vmul.f32 32.0, %v1643_v49  ;;  %vm356_vm12 = vweird.f32 %v1643_v49 }
 0x1f9   :  { %v1218_v30 = vor.u32 %v1305_v15, %v1215_v22  ;;  %v1300_v15 = vld [vmem:[#allocation3 + $0x34] sm:$0xf0] }
 0x1fa   :  { %v1190_v29 = vor.u32 %v1300_v15, %v1189_v8 }
 0x1fc   :  { %676 = vmatpush.bf16.msrb.mxu1 %v1050_v38  ;;  %909 = vmatpush.bf16.msra.mxu0 %v1290_v16  ;;  %v1207_v38 = vld [vmem:[#allocation3 + $0x58] sm:$0xf0]  ;;  %v1253_v16 = vld [vmem:[#allocation3 + $0xb0] sm:$0xf] }
 0x1fd   :  { %v1210_v45 = vor.u32 %v1303_v37, %v1207_v38  ;;  %v1298_v38 = vld [vmem:[#allocation3 + $0x24] sm:$0xf0] }
 0x200   :  { %677 = vmatpush.bf16.msrb.mxu1 %v1042_v47  ;;  %v1302_v47 = vld [vmem:[#allocation3 + $0x44] sm:$0xf0]  ;;  %910 = vmatpush.bf16.msra.mxu0 %v1282_v31  ;;  %v1315_v31 = vld [vmem:[#allocation3 + $0xb4] sm:$0xf] }
 0x204   :  { %896 = vmatpush.bf16.msra.mxu1 %v1226_v61  ;;  %v1202_v61 = vor.u32 %v1301_v53, %v1199_v54  ;;  %911 = vmatpush.bf16.msra.mxu0 %v1274_v50  ;;  %v1173_v53 = vld [vmem:[#allocation3 + $0x10] sm:$0xf]  ;;  %v1296_v54 = vld [vmem:[#allocation3 + $0x14] sm:$0xf0] }
 0x208   :  { %897 = vmatpush.bf16.msra.mxu1 %v1218_v30 }
 0x20c   :  { %898 = vmatpush.bf16.msra.mxu1 %v1210_v45  ;;  %v1313_v45 = vld [vmem:[#allocation3 + $0xa4] sm:$0xf] }
 0x210   :  { %899 = vmatpush.bf16.msra.mxu1 %v1202_v61 }
 0x218   :  { %v1633_v25 = vpop.permute.xlu2 %254 }
 0x228   :  { %v1635_v51 = vpop.permute.xlu2 %285 }
 0x22f   :  { %v280_v27 = vpop.permute.xlu1 %279  ;;  %v261_v28 = vpop.permute.xlu0 %260 }
 0x230   :  { %v1638_v39 = vmul.f32 %v261_v28, %v1585_v11  ;;  %v1641_v40 = vmul.f32 %v261_v28, %v1587_v12  ;;  %v1647_v11 = vmul.f32 %v1633_v25, %v1567_v2  ;;  %v1651_v12 = vmul.f32 %v1633_v25, %v1571_v4  ;;  %v1317_v2 = vld [vmem:[#allocation3 + $0xc4] sm:$0xf] }
 0x231   :  { %v1654_v55 = vmul.f32 %v280_v27, %v1563_v0  ;;  %v1664_v4 = vmul.f32 %v1635_v51, %v1581_v9  ;;  %v1198_v0 = vor.u32 %v1302_v47, %v1197_v46  ;;  %v1677_v9 = vmul.f32 %v1635_v51, %v1583_v10  ;;  %v1316_v51 = vld [vmem:[#allocation3 + $0xb4] sm:$0xf0] }
 0x232   :  { %v315_v25 = vadd.f32 %v1638_v39, %v1647_v11  ;;  %v324_v59 = vadd.f32 %v1641_v40, %v1651_v12  ;;  %v1680_v63 = vmul.f32 %v280_v27, %v1565_v1  ;;  %v371_v3 = vmax.f32 %v1651_v12, %v1641_v40  ;;  %v1299_v1 = vld [vmem:[#allocation3 + $0x34] sm:$0xf] }
 0x233   :  { %v1266_v7 = vor.u32 %v1317_v2, %v1263_v58  ;;  %v333_v17 = vadd.f32 %v1664_v4, %v1654_v55  ;;  %873 = vmatpush.bf16.msrb.mxu2 %v1198_v0  ;;  %v1254_v30 = vor.u32 %v1316_v51, %v1253_v16  ;;  %v1194_v37 = vor.u32 %v1299_v1, %v1191_v24  ;;  %v1312_v0 = vld [vmem:[#allocation3 + $0x94] sm:$0xf0] }
 0x234   :  { %v342_v41 = vadd.f32 %v1677_v9, %v1680_v63  ;;  %v380_v42 = vmax.f32 %v1654_v55, %v1664_v4  ;;  %v1182_v58 = vor.u32 %v1298_v38, %v1181_v33  ;;  %v1294_v33 = vld [vmem:[#allocation3 + $0x4] sm:$0xf0] }
 0x235   :  { %912 = vmatpush.bf16.msra.mxu0 %v1266_v7  ;;  %900 = vmatpush.bf16.msra.mxu1 %v1194_v37  ;;  %v1175_v7 = vld [vmem:[#allocation3 + $0x18] sm:$0xf0] }
 0x237   :  { %874 = vmatpush.bf16.msrb.mxu2 %v1190_v29 }
 0x238   :  { %v267_v36 = vpop.permute.xlu2 %266 }
 0x239   :  { %v1657_v56 = vmul.f32 %v267_v36, %v1573_v5  ;;  %v1660_v57 = vmul.f32 %v267_v36, %v1575_v6  ;;  %v362_v5 = vmax.f32 %v1647_v11, %v1638_v39  ;;  %v1262_v6 = vor.u32 %v1318_v52, %v1261_v48  ;;  %v1245_v36 = vld [vmem:[#allocation3 + $0xa0] sm:$0xf]  ;;  %v1247_v52 = vld [vmem:[#allocation3 + $0xa8] sm:$0xf0] }
 0x23b   :  { %v316_v22 = vadd.f32 %v315_v25, %v1657_v56  ;;  %v325_v23 = vadd.f32 %v324_v59, %v1660_v57  ;;  %v363_v10 = vmax.f32 %v362_v5, %v1657_v56  ;;  %v372_v26 = vmax.f32 %v371_v3, %v1660_v57  ;;  %886 = vmatpush.bf16.msrb.mxu3 %v1262_v6  ;;  %v1237_v59 = vld [vmem:[#allocation3 + $0x90] sm:$0xf]  ;;  %v1295_v5 = vld [vmem:[#allocation3 + $0x14] sm:$0xf] }
 0x23c   :  { %875 = vmatpush.bf16.msrb.mxu2 %v1182_v58 }
 0x23f   :  { %v292_v60 = vpop.permute.xlu1 %291  ;;  %887 = vmatpush.bf16.msrb.mxu3 %v1254_v30  ;;  %v1238_v30 = vor.u32 %v1312_v0, %v1237_v59  ;;  %v1310_v0 = vld [vmem:[#allocation3 + $0x84] sm:$0xf0] }
 0x240   :  { %v1691_v27 = vmul.f32 %v292_v60, %v1589_v13  ;;  %v1314_v13 = vld [vmem:[#allocation3 + $0xa4] sm:$0xf0]  ;;  %v1704_v43 = vmul.f32 %v292_v60, %v1591_v14  ;;  %v389_v14 = vmax.f32 %v1680_v63, %v1677_v9 }
 0x241   :  { %v1246_v25 = vor.u32 %v1314_v13, %v1245_v36 }
 0x242   :  { %v334_v2 = vadd.f32 %v333_v17, %v1691_v27  ;;  %v343_v8 = vadd.f32 %v342_v41, %v1704_v43  ;;  %v381_v15 = vmax.f32 %v380_v42, %v1691_v27  ;;  %v390_v16 = vmax.f32 %v389_v14, %v1704_v43  ;;  %v1229_v14 = vld [vmem:[#allocation3 + $0x80] sm:$0xf] }
 0x243   :  { %v1250_v17 = vor.u32 %v1313_v45, %v1247_v52  ;;  %888 = vmatpush.bf16.msrb.mxu3 %v1246_v25 }
 0x247   :  { %889 = vmatpush.bf16.msrb.mxu3 %v1238_v30 }
 0x248   :  { %v273_v28 = vpop.permute.xlu2 %272 }
 0x249   :  { %v1694_v34 = vmul.f32 %v273_v28, %v1603_v20  ;;  %v1697_v35 = vmul.f32 %v273_v28, %v1605_v21  ;;  %v1258_v20 = vor.u32 %v1315_v31, %v1255_v32  ;;  %v1183_v21 = vld [vmem:[#allocation3 + $0x28] sm:$0xf0]  ;;  %v1178_v31 = vor.u32 %v1295_v5, %v1175_v7  ;;  %v1165_v32 = vld [vmem:[#allocation3] sm:$0xf] }
 0x24a   :  { %v1186_v3 = vor.u32 %v1297_v44, %v1183_v21  ;;  %v1166_v45 = vor.u32 %v1294_v33, %v1165_v32  ;;  %v1167_v5 = vld [vmem:[#allocation3 + $0x8] sm:$0xf0] }
 0x24b   :  { %v317_v46 = vadd.f32 %v316_v22, %v1694_v34  ;;  %v326_v47 = vadd.f32 %v325_v23, %v1697_v35  ;;  %v364_v48 = vmax.f32 %v363_v10, %v1694_v34  ;;  %v373_v50 = vmax.f32 %v372_v26, %v1697_v35  ;;  %913 = vmatpush.bf16.msra.mxu0 %v1258_v20  ;;  %v1311_v22 = vld [vmem:[#allocation3 + $0x94] sm:$0xf]  ;;  %v1239_v23 = vld [vmem:[#allocation3 + $0x98] sm:$0xf0] }
 0x24c   :  { %v1174_v26 = vor.u32 %v1296_v54, %v1173_v53  ;;  %901 = vmatpush.bf16.msra.mxu1 %v1186_v3  ;;  %v1242_v13 = vor.u32 %v1311_v22, %v1239_v23  ;;  %v353_v3 = vsub.f32 1.0, %v1673_v62 }
 0x24d   :  { %v318_v60 = vrot.slane %v317_v46, 4  ;;  %v365_v6 = vrot.slane %v364_v48, 4  ;;  %v374_v61 = vrot.slane %v373_v50, 4  ;;  %v327_v10 = vrot.slane %v326_v47, 4 }
 0x24e   :  { %876 = vmatpush.bf16.msrb.mxu2 %v1174_v26 }
 0x24f   :  { %v366_v51 = vmax.f32 %v364_v48, %v365_v6  ;;  %v375_v1 = vmax.f32 %v373_v50, %v374_v61  ;;  %v298_v24 = vpop.permute.xlu1 %297  ;;  %v319_v37 = vadd.f32 %v318_v60, %v317_v46  ;;  %914 = vmatpush.bf16.msra.mxu0 %v1250_v17  ;;  %v328_v20 = vadd.f32 %v327_v10, %v326_v47  ;;  %v1293_v47 = vld [vmem:[#allocation3 + $0x4] sm:$0xf]  ;;  %v1231_v17 = vld [vmem:[#allocation3 + $0x88] sm:$0xf0] }
 0x250   :  { %v1717_v28 = vmul.f32 %v298_v24, %v1599_v18  ;;  %v1720_v29 = vmul.f32 %v298_v24, %v1601_v19  ;;  %902 = vmatpush.bf16.msra.mxu1 %v1178_v31  ;;  %v1309_v61 = vld [vmem:[#allocation3 + $0x84] sm:$0xf]  ;;  %v1230_v10 = vor.u32 %v1310_v0, %v1229_v14 }
 0x251   :  { %v367_v38 = vrot.slane %v366_v51, 2  ;;  %v376_v36 = vrot.slane %v375_v1, 2  ;;  %v320_v60 = vrot.slane %v319_v37, 2  ;;  %v329_v6 = vrot.slane %v328_v20, 2 }
 0x252   :  { %v335_v41 = vadd.f32 %v334_v2, %v1717_v28  ;;  %v344_v42 = vadd.f32 %v343_v8, %v1720_v29  ;;  %v382_v18 = vmax.f32 %v381_v15, %v1717_v28  ;;  %v391_v19 = vmax.f32 %v390_v16, %v1720_v29  ;;  %877 = vmatpush.bf16.msrb.mxu2 %v1166_v45 }
 0x253   :  { %v368_v44 = vmax.f32 %v366_v51, %v367_v38  ;;  %v377_v21 = vmax.f32 %v375_v1, %v376_v36  ;;  %915 = vmatpush.bf16.msra.mxu0 %v1242_v13  ;;  %v1170_v51 = vor.u32 %v1293_v47, %v1167_v5  ;;  %890 = vmatpush.bf16.msrb.mxu3 %v1230_v10 }
 0x254   :  { %v336_v48 = vrot.slane %v335_v41, 4  ;;  %v345_v46 = vrot.slane %v344_v42, 4  ;;  %v383_v50 = vrot.slane %v382_v18, 4  ;;  %v392_v52 = vrot.slane %v391_v19, 4 }
 0x255   :  { %v369_v53 = vrot.slane %v368_v44, 1  ;;  %v378_v54 = vrot.slane %v377_v21, 1  ;;  %903 = vmatpush.bf16.msra.mxu1 %v1170_v51  ;;  %v1234_v31 = vor.u32 %v1309_v61, %v1231_v17  ;;  %v321_v32 = vadd.f32 %v320_v60, %v319_v37 }
 0x256   :  { %v337_v2 = vadd.f32 %v336_v48, %v335_v41  ;;  %v346_v58 = vadd.f32 %v345_v46, %v344_v42  ;;  %v384_v25 = vmax.f32 %v382_v18, %v383_v50  ;;  %v393_v59 = vmax.f32 %v391_v19, %v392_v52 }
 0x257   :  { %v370_v22 = vmax.f32 %v368_v44, %v369_v53  ;;  %v379_v23 = vmax.f32 %v377_v21, %v378_v54  ;;  %v330_v33 = vadd.f32 %v329_v6, %v328_v20  ;;  %916 = vmatpush.bf16.msra.mxu0 %v1234_v31  ;;  %v354_v41 = vmul.f32 %v1643_v49, %v353_v3 }
 0x258   :  { %v338_v7 = vrot.slane %v337_v2, 2  ;;  %v347_v8 = vrot.slane %v346_v58, 2  ;;  %v385_v15 = vrot.slane %v384_v25, 2  ;;  %v394_v16 = vrot.slane %v393_v59, 2 }
 0x259   :  { %v434_v36 = vpack.c.bf16 %v370_v22, %v370_v22  ;;  %v435_v13 = vpack.c.bf16 %v379_v23, %v379_v23  ;;  %v322_v21 = vrot.slane %v321_v32, 1  ;;  %v331_v45 = vrot.slane %v330_v33, 1 }
 0x25a   :  { %v339_v1 = vadd.f32 %v338_v7, %v337_v2  ;;  %v348_v24 = vadd.f32 %v347_v8, %v346_v58  ;;  %v386_v26 = vmax.f32 %v384_v25, %v385_v15  ;;  %v395_v30 = vmax.f32 %v393_v59, %v394_v16 }
 0x25b   :  { %v474_v50 = vunpack.c.l.b16 %v434_v36  ;;  %v475_v52 = vunpack.c.l.b16 %v435_v13  ;;  %v355_v37 = vadd.f32 %v1643_v49, %v354_v41  ;;  %v323_v2 = vadd.f32 %v322_v21, %v321_v32 }
 0x25c   :  { %v387_v62 = vrot.slane %v386_v26, 1  ;;  %v396_v38 = vrot.slane %v395_v30, 1  ;;  %v340_v42 = vrot.slane %v339_v1, 1  ;;  %v349_v18 = vrot.slane %v348_v24, 1 }
 0x25d   :  { %v332_v58 = vadd.f32 %v331_v45, %v330_v33  ;;  %v357_v5 = vsel %vm356_vm12, %v1643_v49, %v355_v37 }
 0x25e   :  { %v388_v19 = vmax.f32 %v386_v26, %v387_v62  ;;  %v397_v44 = vmax.f32 %v395_v30, %v396_v38  ;;  %v341_v20 = vadd.f32 %v340_v42, %v339_v1  ;;  %v350_v53 = vadd.f32 %v349_v18, %v348_v24 }
 0x25f   :  { %v358_v61 = vmul.f32 %v357_v5, %v323_v2  ;;  %v359_v3 = vmul.f32 %v357_v5, %v332_v58 }
 0x260   :  { %v436_v48 = vpack.c.bf16 %v388_v19, %v388_v19  ;;  %v437_v46 = vpack.c.bf16 %v397_v44, %v397_v44  ;;  %v360_v60 = vmul.f32 %v357_v5, %v341_v20  ;;  %v361_v6 = vmul.f32 %v357_v5, %v350_v53 }
 0x261   :  { %v398_v15 = vpack.c.bf16 %v358_v61, %v358_v61  ;;  %v399_v16 = vpack.c.bf16 %v359_v3, %v359_v3  ;;  %v923_v19 = vstv %s1767_s6  ;;  %s1015_s6 = sshll.u32 %s1505_s3, 4  ;;  %s1016_s6 = int_to_ptr.vmem [resolvable:$true] %s1015_s6 }
 0x262   :  { %v476_v54 = vunpack.c.l.b16 %v436_v48  ;;  %v477_v14 = vunpack.c.l.b16 %v437_v46  ;;  %v400_v7 = vpack.c.bf16 %v360_v60, %v360_v60  ;;  %v401_v8 = vpack.c.bf16 %v361_v6, %v361_v6 }
 0x263   :  { %v700_v23 = vunpack.c.l.b16 %v398_v15  ;;  %v701_v10 = vunpack.c.l.b16 %v399_v16 }
 0x264   :  { %v478_v25 = vsel %vm171_vm4, %v476_v54, %v474_v50  ;;  %v479_v59 = vsel %vm171_vm4, %v477_v14, %v475_v52  ;;  %v702_v17 = vunpack.c.l.b16 %v400_v7  ;;  %v703_v22 = vunpack.c.l.b16 %v401_v8 }
 0x265   :  { %v480_v0 = vpack.c.b16 %v478_v25, %v478_v25  ;;  %v481_v47 = vpack.c.b16 %v479_v59, %v479_v59 }
 0x266   :  { %v704_v51 = vsel %vm171_vm4, %v702_v17, %v700_v23  ;;  %v705_v49 = vsel %vm171_vm4, %v703_v22, %v701_v10 }
 0x267   :  { %652 = vmatmul.bf16.vlgmr.msra.gmra.mxu2 %v480_v0  ;;  %665 = vmatmul.bf16.vlgmr.msra.gmra.mxu3 %v481_v47  ;;  %v706_v1 = vpack.c.b16 %v704_v51, %v704_v51  ;;  %v707_v24 = vpack.c.b16 %v705_v49, %v705_v49 }
 0x268   :  { %678 = vmatmul.bf16.vlgmr.msrb.gmra.mxu1 %v480_v0  ;;  %691 = vmatmul.bf16.vlgmr.msrb.gmra.mxu0 %v481_v47 }
 0x277   :  { %878 = vmatmul.bf16.vlgmr.msrb.gmra.mxu2 %v706_v1  ;;  %891 = vmatmul.bf16.vlgmr.msrb.gmra.mxu3 %v707_v24 }
 0x278   :  { %904 = vmatmul.bf16.vlgmr.msra.gmra.mxu1 %v706_v1  ;;  %917 = vmatmul.bf16.vlgmr.msra.gmra.mxu0 %v707_v24 }
 0x2e5   :  { %v679_v26 = vpop.f32.mrf.mxu1  ;;  %v692_v30 = vpop.f32.mrf.mxu0 }
 0x2e6   :  { %v693_v13 = vadd.f32 %v692_v30, %v679_v26 }
 0x2ea   :  { %v653_v31 = vpop.f32.mrf.mxu2  ;;  %v666_v32 = vpop.f32.mrf.mxu3 }
 0x2eb   :  { %v667_v21 = vadd.f32 %v666_v32, %v653_v31 }
 0x2ed   :  { %v681_v33 = vpop.f32.mrf.mxu1  ;;  %v694_v62 = vpop.f32.mrf.mxu0 }
 0x2f2   :  { %v655_v38 = vpop.f32.mrf.mxu2  ;;  %v668_v36 = vpop.f32.mrf.mxu3 }
 0x2f5   :  { %v905_v41 = vpop.f32.mrf.mxu1  ;;  %v918_v42 = vpop.f32.mrf.mxu0 }
 0x2f6   :  { %v906_v18 = vadd.f32 %v905_v41, %v693_v13 }
 0x2f8   :  { %v919_v44 = vadd.f32 %v918_v42, %v906_v18 }
 0x2fa   :  { %v925_v45 = vadd.f32 %v923_v19, %v919_v44  ;;  %v879_v48 = vpop.f32.mrf.mxu2  ;;  %v892_v46 = vpop.f32.mrf.mxu3 }
 0x2fb   :  { %v880_v50 = vadd.f32 %v879_v48, %v667_v21 }
 0x2fc   :  { %v1292_v52 = vmul.f32 -1.442695, %v925_v45 }
 0x2fd   :  { %v893_v37 = vadd.f32 %v892_v46, %v880_v50  ;;  %v907_v20 = vpop.f32.mrf.mxu1  ;;  %v920_v53 = vpop.f32.mrf.mxu0 }
 0x2fe   :  { %1386 = vpow2.f32 %v1292_v52 }
 0x2ff   :  { %v924_v54 = vadd.f32 %v923_v19, %v893_v37 }
 0x301   :  { %v1291_v14 = vmul.f32 -1.442695, %v924_v54 }
 0x302   :  { %v881_v2 = vpop.f32.mrf.mxu2  ;;  %v894_v58 = vpop.f32.mrf.mxu3 }
 0x303   :  { %1388 = vpow2.f32 %v1291_v14 }
 0x304   :  { %v1387_v25 = vpop.eup %1386 }
 0x305   :  { %v933_v59 = vadd.f32 1.0, %v1387_v25 }
 0x307   :  { %1390 = vrcp.f32 %v933_v59  ;;  %v960_v7 = vand.u32 2147483648, %v933_v59  ;;  %v958_v8 = vand.u32 2147483647, %v933_v59  ;;  %vm954_vm14 = vweird.f32 %v933_v59 }
 0x309   :  { %v1389_v0 = vpop.eup %1388  ;;  %v961_v23 = vor.u32 1.1754944e-38, %v960_v7  ;;  %vm959_vm0 = vcmp.eq.f32.partialorder %v958_v8, 8.507059e+37 }
 0x30a   :  { %v932_v47 = vadd.f32 1.0, %v1389_v0 }
 0x30c   :  { %1392 = vrcp.f32 %v932_v47  ;;  %v945_v10 = vand.u32 2147483648, %v932_v47  ;;  %v943_v49 = vand.u32 2147483647, %v932_v47  ;;  %vm939_vm2 = vweird.f32 %v932_v47 }
 0x30d   :  { %v1391_v5 = vpop.eup %1390 }
 0x30e   :  { %v950_v60 = vmul.f32 %v1391_v5, %v933_v59  ;;  %vm955_vm13 = vweird.f32 %v1391_v5  ;;  %v946_v26 = vor.u32 1.1754944e-38, %v945_v10  ;;  %vm944_vm6 = vcmp.eq.f32.partialorder %v943_v49, 8.507059e+37 }
 0x30f   :  { %vm956_vm15 = vmor %vm954_vm14, %vm955_vm13 }
 0x310   :  { %v951_v6 = vsub.f32 1.0, %v950_v60 }
 0x312   :  { %v1393_v61 = vpop.eup %1392  ;;  %v952_v3 = vmul.f32 %v1391_v5, %v951_v6 }
 0x313   :  { %v935_v15 = vmul.f32 %v1393_v61, %v932_v47  ;;  %vm940_vm1 = vweird.f32 %v1393_v61 }
 0x314   :  { %v953_v16 = vadd.f32 %v1391_v5, %v952_v3  ;;  %vm941_vm3 = vmor %vm939_vm2, %vm940_vm1 }
 0x315   :  { %v936_v17 = vsub.f32 1.0, %v935_v15 }
 0x316   :  { %v957_v22 = vsel %vm956_vm15, %v1391_v5, %v953_v16 }
 0x317   :  { %v937_v51 = vmul.f32 %v1393_v61, %v936_v17  ;;  %v962_v1 = vsel %vm959_vm0, %v961_v23, %v957_v22 }
 0x318   :  { %v966_v30 = vrot.slane %v962_v1, 7 }
 0x319   :  { %v938_v24 = vadd.f32 %v1393_v61, %v937_v51 }
 0x31b   :  { %v942_v31 = vsel %vm941_vm3, %v1393_v61, %v938_v24 }
 0x31c   :  { %v947_v32 = vsel %vm944_vm6, %v946_v26, %v942_v31 }
 0x31d   :  { %v968_v33 = vsel %vm967_vm5, %v947_v32, %v966_v30  ;;  %v969_v62 = vsel %vm171_vm4, %v947_v32, %v966_v30 }
 0x31e   :  { %v970_v38 = vrot.slane %v969_v62, 1  ;;  %v971_v36 = vperm.slane %v968_v33, 0  ;;  %v972_v13 = vperm.slane %v968_v33, 1 }
 0x320   :  { %v979_v41 = vmul.f32 %v971_v36, %v1647_v11  ;;  %v980_v42 = vmul.f32 %v972_v13, %v1651_v12  ;;  %v981_v18 = vmul.f32 %v971_v36, %v1638_v39  ;;  %v982_v19 = vmul.f32 %v972_v13, %v1641_v40 }
 0x321   :  { %v973_v44 = vperm.slane %v970_v38, 0  ;;  %v983_v21 = vmul.f32 %v971_v36, %v1657_v56  ;;  %v974_v45 = vperm.slane %v970_v38, 1  ;;  %v984_v48 = vmul.f32 %v972_v13, %v1660_v57 }
 0x322   :  { %995 = vst [vmem:[#allocation9] sm:$0xff] %v979_v41  ;;  %v985_v46 = vmul.f32 %v971_v36, %v1694_v34  ;;  %v986_v50 = vmul.f32 %v972_v13, %v1697_v35 }
 0x323   :  { %996 = vst [vmem:[#allocation9 + $0x8] sm:$0xff] %v980_v42  ;;  %v987_v11 = vmul.f32 %v973_v44, %v1654_v55  ;;  %v988_v39 = vmul.f32 %v974_v45, %v1680_v63  ;;  %v989_v40 = vmul.f32 %v973_v44, %v1664_v4  ;;  %v990_v12 = vmul.f32 %v974_v45, %v1677_v9 }
 0x324   :  { %997 = vst [vmem:[#allocation9 + $0x10] sm:$0xff] %v981_v18  ;;  %v991_v56 = vmul.f32 %v973_v44, %v1691_v27  ;;  %v992_v57 = vmul.f32 %v974_v45, %v1704_v43  ;;  %v993_v34 = vmul.f32 %v973_v44, %v1717_v28  ;;  %v994_v55 = vmul.f32 %v974_v45, %v1720_v29 }
 0x325   :  { %998 = vst [vmem:[#allocation9 + $0x18] sm:$0xff] %v982_v19 }
 0x326   :  { %999 = vst [vmem:[#allocation9 + $0x20] sm:$0xff] %v983_v21 }
 0x327   :  { %1000 = vst [vmem:[#allocation9 + $0x28] sm:$0xff] %v984_v48 }
 0x328   :  { %1001 = vst [vmem:[#allocation9 + $0x30] sm:$0xff] %v985_v46 }
 0x329   :  { %1002 = vst [vmem:[#allocation9 + $0x38] sm:$0xff] %v986_v50 }
 0x32a   :  { %1003 = vst [vmem:[#allocation9 + $0x40] sm:$0xff] %v987_v11 }
 0x32b   :  { %1004 = vst [vmem:[#allocation9 + $0x48] sm:$0xff] %v988_v39 }
 0x32c   :  { %1005 = vst [vmem:[#allocation9 + $0x50] sm:$0xff] %v989_v40 }
 0x32d   :  { %1006 = vst [vmem:[#allocation9 + $0x58] sm:$0xff] %v990_v12 }
 0x32e   :  { %1007 = vst [vmem:[#allocation9 + $0x60] sm:$0xff] %v991_v56 }
 0x32f   :  { %1008 = vst [vmem:[#allocation9 + $0x68] sm:$0xff] %v992_v57 }
 0x330   :  { %1009 = vst [vmem:[#allocation9 + $0x70] sm:$0xff] %v993_v34 }
 0x331   :  { %1010 = vst [vmem:[#allocation9 + $0x78] sm:$0xff] %v994_v55 }
 0x332   :  { %1023 = dma.vmem_to_hbm [thread:$0]  %s1016_s6, 2048, %s1018_s14, [#allocation5], %s1501_s21, %s1501_s21, %s1502_s22  }
 0x333   :  { %1494 = dma.done.wait [#allocation5], 2048  }
 0x334   :  { %1495 = vsyncadd [#allocation5], 4294965248 }
 0x335   :  { %1028 = vsyncpa [#allocation4], 1 }
 0x336   :  { %1029 = vsyncpa [#allocation7], 1 }
 0x337   :  { %1030 = vsyncpa [#allocation5], 1 }

</bundles_post_ra>
